<compile_context>
chip_gen: v7x
topology: tpu7x:2x2x1
jax: 0.10.0
libtpu: 0.0.40
codegen_flags: <defaults>
</compile_context>

<pallas_src>
import functools

import jax
import jax.numpy as jnp
from jax.experimental import pallas as pl
from jax.experimental.pallas import tpu as pltpu

KSIZE = 7
PAD = (KSIZE - 1) // 2  # 3


def _spatial_gate_kernel(w_ref, b_ref, x_ref, o_ref, *, H, W, B):
    """Processes B batch items per grid step.

    w_ref : SMEM (2*7*7,) f32 -- [max-channel taps (49), mean-channel taps (49)],
                                 mean taps pre-scaled by 1/C on the host
    b_ref : SMEM (1,)     f32 -- conv bias
    x_ref : VMEM (B, C, HW) f32 -- batch block, spatial dims flattened
    o_ref : VMEM (B, C, HW) f32
    """
    HW = H * W
    xin = x_ref[...]                               # (B, C, HW)

    # --- ChannelPool: channel max & channel sum (1/C folded into weights) ---
    mx = jnp.max(xin, axis=1)                      # (B, HW)
    sm = jnp.sum(xin, axis=1)                      # (B, HW)

    # Sublane-stack the two pooled maps: rows [0:B] = max, rows [B:2B] = sum.
    # Both maps now share the same vregs, so each tap below needs one roll,
    # one mask select and one weighted MAC instead of two of each.
    pooled = jnp.concatenate([mx, sm], axis=0)     # (2B, HW)

    # --- index planes & boundary masks, built at (2B, HW) so everything in
    # the tap loop broadcasts trivially (same vreg shape as pooled) ----------
    p = jax.lax.broadcasted_iota(jnp.int32, (2 * B, HW), 1)   # flat position
    if W & (W - 1) == 0:
        w_idx = p & (W - 1)                        # power-of-two W: cheap AND
    else:
        # TODO(synk): vector int mod is expensive on the VPU; for non-pow2 W
        # precompute the 49 combined masks host-side and pass them as input.
        w_idx = p % W
    half_sel = jax.lax.broadcasted_iota(jnp.int32, (2 * B, HW), 0) < B  # max rows

    # Zero-padding masks for the 7x7 'same' conv.  Roll-wraparound positions
    # coincide exactly with padding positions, so one mask per tap covers both
    # (valid only for stride=1, 'same' padding).
    # TODO(synk): for large H*W, compute the combined mask inside the tap loop
    # (or stage in VMEM scratch) instead of keeping 14 planes live.
    row_ok = [((p + (ki - PAD) * W) >= 0) & ((p + (ki - PAD) * W) < HW)
              for ki in range(KSIZE)]
    col_ok = [((w_idx + (kj - PAD)) >= 0) & ((w_idx + (kj - PAD)) < W)
              for kj in range(KSIZE)]

    # --- 7x7 conv, 2 in-channels (max, mean), 1 out-channel, 'same' ---------
    acc = jnp.zeros((2 * B, HW), dtype=jnp.float32)
    for ki in range(KSIZE):
        di = ki - PAD
        for kj in range(KSIZE):
            dj = kj - PAD
            t = ki * KSIZE + kj
            sh = (-(di * W + dj)) % HW
            rolled = pooled if sh == 0 else pltpu.roll(pooled, sh, axis=1)
            mask = row_ok[ki] & col_ok[kj]
            # Per-sublane weight plane: max rows use w[0,ki,kj], sum rows use
            # w[1,ki,kj]/C (1/C folded on the host).
            w_plane = jnp.where(half_sel, w_ref[t], w_ref[KSIZE * KSIZE + t])
            acc = acc + jnp.where(mask, w_plane * rolled, 0.0)

    conv = acc[:B] + acc[B:] + b_ref[0]            # (B, HW)
    scale = jax.nn.sigmoid(conv)

    # --- gate: reuse the already-loaded xin (single read stream per tile) ---
    o_ref[...] = xin * scale[:, None, :]


def _pick_batch_block(N, C, HW):
    """Batch items per grid step: big enough to amortize the ~0.35us per-step
    overhead, small enough that double-buffered in+out f32 blocks stay well
    under v5e's 16 MiB scoped-VMEM default (and v7x's 64 MiB physical), and
    grid length stays >= 2 so both v7x TensorCores get work."""
    budget = 8 * 1024 * 1024
    per_item = 4 * C * HW * 4                      # in+out, double-buffered, f32
    b = max(1, min(N, budget // max(per_item, 1)))
    if N >= 2:
        b = min(b, N // 2)
    b = max(1, b)
    while N % b:                                   # avoid a ragged last block
        b -= 1
    return b


@jax.jit
def spatial_gate(x, weight, bias):
    """x: (N, C, H, W) f32; weight: (1, 2, 7, 7) f32; bias: (1,) f32."""
    N, C, H, W = x.shape
    HW = H * W
    x_flat = x.astype(jnp.float32).reshape(N, C, HW)   # free metadata reshape

    # Flatten weights as [max-channel taps, mean-channel taps]; fold 1/C of
    # the channel-mean into the mean-channel taps so the kernel only sums.
    w_max = weight[0, 0].reshape(-1).astype(jnp.float32)
    w_mean = weight[0, 1].reshape(-1).astype(jnp.float32) * (1.0 / C)
    w_flat = jnp.concatenate([w_max, w_mean])           # (2*7*7,)
    b = bias.astype(jnp.float32)                         # (1,)

    B = _pick_batch_block(N, C, HW)
    kernel = functools.partial(_spatial_gate_kernel, H=H, W=W, B=B)

    out_flat = pl.pallas_call(
        kernel,
        out_shape=jax.ShapeDtypeStruct((N, C, HW), jnp.float32),
        grid=(N // B,),
        in_specs=[
            pl.BlockSpec(memory_space=pltpu.MemorySpace.SMEM),   # conv weights
            pl.BlockSpec(memory_space=pltpu.MemorySpace.SMEM),   # conv bias
            pl.BlockSpec((B, C, HW), lambda n: (n, 0, 0)),       # x block (VMEM)
        ],
        out_specs=pl.BlockSpec((B, C, HW), lambda n: (n, 0, 0)),
        compiler_params=pltpu.CompilerParams(
            dimension_semantics=("parallel",)),
    )(w_flat, b, x_flat)
    return out_flat.reshape(N, C, H, W).astype(x.dtype)


def spatial_gate_reference(x, weight, bias):
    """Pure-JAX reference (mirrors the PyTorch forward) for a sanity check."""
    mx = jnp.max(x, axis=1, keepdims=True)
    mn = jnp.mean(x, axis=1, keepdims=True)
    pooled = jnp.concatenate([mx, mn], axis=1)  # (N, 2, H, W)
    conv = jax.lax.conv_general_dilated(
        pooled, weight, window_strides=(1, 1),
        padding=((PAD, PAD), (PAD, PAD)),
        dimension_numbers=("NCHW", "OIHW", "NCHW"),
    ) + bias.reshape(1, 1, 1, 1)
    return x * jax.nn.sigmoid(conv)


if __name__ == "__main__":
    key = jax.random.PRNGKey(0)
    kx, kw, kb = jax.random.split(key, 3)

    N, C, H, W = 2, 4, 16, 16
    x = jax.random.normal(kx, (N, C, H, W), dtype=jnp.float32)

    # Deterministic "Conv2d(2, 1, kernel_size=7, bias=True)" parameters.
    fan_in = 2 * KSIZE * KSIZE
    bound = 1.0 / (fan_in ** 0.5)
    weight = jax.random.uniform(kw, (1, 2, KSIZE, KSIZE),
                                minval=-bound, maxval=bound, dtype=jnp.float32)
    bias = jax.random.uniform(kb, (1,), minval=-bound, maxval=bound,
                              dtype=jnp.float32)

    out = jax.block_until_ready(spatial_gate(x, weight, bias))
    ref = spatial_gate_reference(x, weight, bias)

    assert out.shape == (N, C, H, W)
    assert jnp.allclose(out, ref, atol=1e-5, rtol=1e-5), "mismatch vs reference"

    print("KERNEL_OK")
</pallas_src>

<mosaic_0001>
module attributes {stable_mosaic.version = 11 : i64} {
  func.func @_spatial_gate_kernel(%arg0: i32, %arg1: memref<98xf32, #tpu.memory_space<smem>>, %arg2: memref<1xf32, #tpu.memory_space<smem>>, %arg3: memref<1x4x256xf32, #tpu.memory_space<vmem>>, %arg4: memref<1x4x256xf32, #tpu.memory_space<vmem>>) attributes {dimension_semantics = [#tpu.dimension_semantics<parallel>], iteration_bounds = array<i64: 2>, scalar_prefetch = 0 : i64, scratch_operands = 0 : i64, tpu.core_type = #tpu.core_type<tc>, window_params = [{transform_indices = @transform_0, window_bounds = array<i64: 98>}, {transform_indices = @transform_1, window_bounds = array<i64: 1>}, {transform_indices = @transform_2, window_bounds = array<i64: 1, 4, 256>}, {transform_indices = @transform_3, window_bounds = array<i64: 1, 4, 256>}]} {
    %c0 = arith.constant 0 : index
    %c0_0 = arith.constant 0 : index
    %c0_1 = arith.constant 0 : index
    %0 = vector.load %arg3[%c0, %c0_0, %c0_1] : memref<1x4x256xf32, #tpu.memory_space<vmem>>, vector<1x4x256xf32>
    %cst = arith.constant dense<0xFF800000> : vector<1x256xf32>
    %1 = vector.multi_reduction <maximumf>, %0, %cst [1] : vector<1x4x256xf32> to vector<1x256xf32>
    %cst_2 = arith.constant dense<0.000000e+00> : vector<1x256xf32>
    %2 = vector.multi_reduction <add>, %0, %cst_2 [1] : vector<1x4x256xf32> to vector<1x256xf32>
    %3 = tpu.concatenate %1, %2 in 0 : vector<1x256xf32>, vector<1x256xf32> -> vector<2x256xf32>
    %4 = tpu.iota {dimensions = array<i32: 1>} : vector<2x256xi32>
    %c15_i32 = arith.constant 15 : i32
    %5 = vector.broadcast %c15_i32 : i32 to vector<2x256xi32>
    %6 = arith.andi %4, %5 : vector<2x256xi32>
    %7 = tpu.iota {dimensions = array<i32: 0>} : vector<2x256xi32>
    %c1_i32 = arith.constant 1 : i32
    %8 = vector.broadcast %c1_i32 : i32 to vector<2x256xi32>
    %9 = arith.cmpi slt, %7, %8 : vector<2x256xi32>
    %c-48_i32 = arith.constant -48 : i32
    %10 = vector.broadcast %c-48_i32 : i32 to vector<2x256xi32>
    %11 = arith.addi %4, %10 : vector<2x256xi32>
    %c0_i32 = arith.constant 0 : i32
    %12 = vector.broadcast %c0_i32 : i32 to vector<2x256xi32>
    %13 = arith.cmpi sge, %11, %12 : vector<2x256xi32>
    %c-48_i32_3 = arith.constant -48 : i32
    %14 = vector.broadcast %c-48_i32_3 : i32 to vector<2x256xi32>
    %15 = arith.addi %4, %14 : vector<2x256xi32>
    %c256_i32 = arith.constant 256 : i32
    %16 = vector.broadcast %c256_i32 : i32 to vector<2x256xi32>
    %17 = arith.cmpi slt, %15, %16 : vector<2x256xi32>
    %18 = arith.andi %13, %17 : vector<2x256xi1>
    %c-32_i32 = arith.constant -32 : i32
    %19 = vector.broadcast %c-32_i32 : i32 to vector<2x256xi32>
    %20 = arith.addi %4, %19 : vector<2x256xi32>
    %c0_i32_4 = arith.constant 0 : i32
    %21 = vector.broadcast %c0_i32_4 : i32 to vector<2x256xi32>
    %22 = arith.cmpi sge, %20, %21 : vector<2x256xi32>
    %c-32_i32_5 = arith.constant -32 : i32
    %23 = vector.broadcast %c-32_i32_5 : i32 to vector<2x256xi32>
    %24 = arith.addi %4, %23 : vector<2x256xi32>
    %c256_i32_6 = arith.constant 256 : i32
    %25 = vector.broadcast %c256_i32_6 : i32 to vector<2x256xi32>
    %26 = arith.cmpi slt, %24, %25 : vector<2x256xi32>
    %27 = arith.andi %22, %26 : vector<2x256xi1>
    %c-16_i32 = arith.constant -16 : i32
    %28 = vector.broadcast %c-16_i32 : i32 to vector<2x256xi32>
    %29 = arith.addi %4, %28 : vector<2x256xi32>
    %c0_i32_7 = arith.constant 0 : i32
    %30 = vector.broadcast %c0_i32_7 : i32 to vector<2x256xi32>
    %31 = arith.cmpi sge, %29, %30 : vector<2x256xi32>
    %c-16_i32_8 = arith.constant -16 : i32
    %32 = vector.broadcast %c-16_i32_8 : i32 to vector<2x256xi32>
    %33 = arith.addi %4, %32 : vector<2x256xi32>
    %c256_i32_9 = arith.constant 256 : i32
    %34 = vector.broadcast %c256_i32_9 : i32 to vector<2x256xi32>
    %35 = arith.cmpi slt, %33, %34 : vector<2x256xi32>
    %36 = arith.andi %31, %35 : vector<2x256xi1>
    %c0_i32_10 = arith.constant 0 : i32
    %37 = vector.broadcast %c0_i32_10 : i32 to vector<2x256xi32>
    %38 = arith.addi %4, %37 : vector<2x256xi32>
    %c0_i32_11 = arith.constant 0 : i32
    %39 = vector.broadcast %c0_i32_11 : i32 to vector<2x256xi32>
    %40 = arith.cmpi sge, %38, %39 : vector<2x256xi32>
    %c0_i32_12 = arith.constant 0 : i32
    %41 = vector.broadcast %c0_i32_12 : i32 to vector<2x256xi32>
    %42 = arith.addi %4, %41 : vector<2x256xi32>
    %c256_i32_13 = arith.constant 256 : i32
    %43 = vector.broadcast %c256_i32_13 : i32 to vector<2x256xi32>
    %44 = arith.cmpi slt, %42, %43 : vector<2x256xi32>
    %45 = arith.andi %40, %44 : vector<2x256xi1>
    %c16_i32 = arith.constant 16 : i32
    %46 = vector.broadcast %c16_i32 : i32 to vector<2x256xi32>
    %47 = arith.addi %4, %46 : vector<2x256xi32>
    %c0_i32_14 = arith.constant 0 : i32
    %48 = vector.broadcast %c0_i32_14 : i32 to vector<2x256xi32>
    %49 = arith.cmpi sge, %47, %48 : vector<2x256xi32>
    %c16_i32_15 = arith.constant 16 : i32
    %50 = vector.broadcast %c16_i32_15 : i32 to vector<2x256xi32>
    %51 = arith.addi %4, %50 : vector<2x256xi32>
    %c256_i32_16 = arith.constant 256 : i32
    %52 = vector.broadcast %c256_i32_16 : i32 to vector<2x256xi32>
    %53 = arith.cmpi slt, %51, %52 : vector<2x256xi32>
    %54 = arith.andi %49, %53 : vector<2x256xi1>
    %c32_i32 = arith.constant 32 : i32
    %55 = vector.broadcast %c32_i32 : i32 to vector<2x256xi32>
    %56 = arith.addi %4, %55 : vector<2x256xi32>
    %c0_i32_17 = arith.constant 0 : i32
    %57 = vector.broadcast %c0_i32_17 : i32 to vector<2x256xi32>
    %58 = arith.cmpi sge, %56, %57 : vector<2x256xi32>
    %c32_i32_18 = arith.constant 32 : i32
    %59 = vector.broadcast %c32_i32_18 : i32 to vector<2x256xi32>
    %60 = arith.addi %4, %59 : vector<2x256xi32>
    %c256_i32_19 = arith.constant 256 : i32
    %61 = vector.broadcast %c256_i32_19 : i32 to vector<2x256xi32>
    %62 = arith.cmpi slt, %60, %61 : vector<2x256xi32>
    %63 = arith.andi %58, %62 : vector<2x256xi1>
    %c48_i32 = arith.constant 48 : i32
    %64 = vector.broadcast %c48_i32 : i32 to vector<2x256xi32>
    %65 = arith.addi %4, %64 : vector<2x256xi32>
    %c0_i32_20 = arith.constant 0 : i32
    %66 = vector.broadcast %c0_i32_20 : i32 to vector<2x256xi32>
    %67 = arith.cmpi sge, %65, %66 : vector<2x256xi32>
    %c48_i32_21 = arith.constant 48 : i32
    %68 = vector.broadcast %c48_i32_21 : i32 to vector<2x256xi32>
    %69 = arith.addi %4, %68 : vector<2x256xi32>
    %c256_i32_22 = arith.constant 256 : i32
    %70 = vector.broadcast %c256_i32_22 : i32 to vector<2x256xi32>
    %71 = arith.cmpi slt, %69, %70 : vector<2x256xi32>
    %72 = arith.andi %67, %71 : vector<2x256xi1>
    %c-3_i32 = arith.constant -3 : i32
    %73 = vector.broadcast %c-3_i32 : i32 to vector<2x256xi32>
    %74 = arith.addi %6, %73 : vector<2x256xi32>
    %c0_i32_23 = arith.constant 0 : i32
    %75 = vector.broadcast %c0_i32_23 : i32 to vector<2x256xi32>
    %76 = arith.cmpi sge, %74, %75 : vector<2x256xi32>
    %c-3_i32_24 = arith.constant -3 : i32
    %77 = vector.broadcast %c-3_i32_24 : i32 to vector<2x256xi32>
    %78 = arith.addi %6, %77 : vector<2x256xi32>
    %c16_i32_25 = arith.constant 16 : i32
    %79 = vector.broadcast %c16_i32_25 : i32 to vector<2x256xi32>
    %80 = arith.cmpi slt, %78, %79 : vector<2x256xi32>
    %81 = arith.andi %76, %80 : vector<2x256xi1>
    %c-2_i32 = arith.constant -2 : i32
    %82 = vector.broadcast %c-2_i32 : i32 to vector<2x256xi32>
    %83 = arith.addi %6, %82 : vector<2x256xi32>
    %c0_i32_26 = arith.constant 0 : i32
    %84 = vector.broadcast %c0_i32_26 : i32 to vector<2x256xi32>
    %85 = arith.cmpi sge, %83, %84 : vector<2x256xi32>
    %c-2_i32_27 = arith.constant -2 : i32
    %86 = vector.broadcast %c-2_i32_27 : i32 to vector<2x256xi32>
    %87 = arith.addi %6, %86 : vector<2x256xi32>
    %c16_i32_28 = arith.constant 16 : i32
    %88 = vector.broadcast %c16_i32_28 : i32 to vector<2x256xi32>
    %89 = arith.cmpi slt, %87, %88 : vector<2x256xi32>
    %90 = arith.andi %85, %89 : vector<2x256xi1>
    %c-1_i32 = arith.constant -1 : i32
    %91 = vector.broadcast %c-1_i32 : i32 to vector<2x256xi32>
    %92 = arith.addi %6, %91 : vector<2x256xi32>
    %c0_i32_29 = arith.constant 0 : i32
    %93 = vector.broadcast %c0_i32_29 : i32 to vector<2x256xi32>
    %94 = arith.cmpi sge, %92, %93 : vector<2x256xi32>
    %c-1_i32_30 = arith.constant -1 : i32
    %95 = vector.broadcast %c-1_i32_30 : i32 to vector<2x256xi32>
    %96 = arith.addi %6, %95 : vector<2x256xi32>
    %c16_i32_31 = arith.constant 16 : i32
    %97 = vector.broadcast %c16_i32_31 : i32 to vector<2x256xi32>
    %98 = arith.cmpi slt, %96, %97 : vector<2x256xi32>
    %99 = arith.andi %94, %98 : vector<2x256xi1>
    %c0_i32_32 = arith.constant 0 : i32
    %100 = vector.broadcast %c0_i32_32 : i32 to vector<2x256xi32>
    %101 = arith.addi %6, %100 : vector<2x256xi32>
    %c0_i32_33 = arith.constant 0 : i32
    %102 = vector.broadcast %c0_i32_33 : i32 to vector<2x256xi32>
    %103 = arith.cmpi sge, %101, %102 : vector<2x256xi32>
    %c0_i32_34 = arith.constant 0 : i32
    %104 = vector.broadcast %c0_i32_34 : i32 to vector<2x256xi32>
    %105 = arith.addi %6, %104 : vector<2x256xi32>
    %c16_i32_35 = arith.constant 16 : i32
    %106 = vector.broadcast %c16_i32_35 : i32 to vector<2x256xi32>
    %107 = arith.cmpi slt, %105, %106 : vector<2x256xi32>
    %108 = arith.andi %103, %107 : vector<2x256xi1>
    %c1_i32_36 = arith.constant 1 : i32
    %109 = vector.broadcast %c1_i32_36 : i32 to vector<2x256xi32>
    %110 = arith.addi %6, %109 : vector<2x256xi32>
    %c0_i32_37 = arith.constant 0 : i32
    %111 = vector.broadcast %c0_i32_37 : i32 to vector<2x256xi32>
    %112 = arith.cmpi sge, %110, %111 : vector<2x256xi32>
    %c1_i32_38 = arith.constant 1 : i32
    %113 = vector.broadcast %c1_i32_38 : i32 to vector<2x256xi32>
    %114 = arith.addi %6, %113 : vector<2x256xi32>
    %c16_i32_39 = arith.constant 16 : i32
    %115 = vector.broadcast %c16_i32_39 : i32 to vector<2x256xi32>
    %116 = arith.cmpi slt, %114, %115 : vector<2x256xi32>
    %117 = arith.andi %112, %116 : vector<2x256xi1>
    %c2_i32 = arith.constant 2 : i32
    %118 = vector.broadcast %c2_i32 : i32 to vector<2x256xi32>
    %119 = arith.addi %6, %118 : vector<2x256xi32>
    %c0_i32_40 = arith.constant 0 : i32
    %120 = vector.broadcast %c0_i32_40 : i32 to vector<2x256xi32>
    %121 = arith.cmpi sge, %119, %120 : vector<2x256xi32>
    %c2_i32_41 = arith.constant 2 : i32
    %122 = vector.broadcast %c2_i32_41 : i32 to vector<2x256xi32>
    %123 = arith.addi %6, %122 : vector<2x256xi32>
    %c16_i32_42 = arith.constant 16 : i32
    %124 = vector.broadcast %c16_i32_42 : i32 to vector<2x256xi32>
    %125 = arith.cmpi slt, %123, %124 : vector<2x256xi32>
    %126 = arith.andi %121, %125 : vector<2x256xi1>
    %c3_i32 = arith.constant 3 : i32
    %127 = vector.broadcast %c3_i32 : i32 to vector<2x256xi32>
    %128 = arith.addi %6, %127 : vector<2x256xi32>
    %c0_i32_43 = arith.constant 0 : i32
    %129 = vector.broadcast %c0_i32_43 : i32 to vector<2x256xi32>
    %130 = arith.cmpi sge, %128, %129 : vector<2x256xi32>
    %c3_i32_44 = arith.constant 3 : i32
    %131 = vector.broadcast %c3_i32_44 : i32 to vector<2x256xi32>
    %132 = arith.addi %6, %131 : vector<2x256xi32>
    %c16_i32_45 = arith.constant 16 : i32
    %133 = vector.broadcast %c16_i32_45 : i32 to vector<2x256xi32>
    %134 = arith.cmpi slt, %132, %133 : vector<2x256xi32>
    %135 = arith.andi %130, %134 : vector<2x256xi1>
    %cst_46 = arith.constant 0.000000e+00 : f32
    %136 = vector.broadcast %cst_46 : f32 to vector<2x256xf32>
    %c51_i32 = arith.constant 51 : i32
    %137 = tpu.dynamic_rotate %3 by %c51_i32 dim 1 : vector<2x256xf32>, i32 -> vector<2x256xf32>
    %138 = arith.andi %18, %81 : vector<2x256xi1>
    %c0_47 = arith.constant 0 : index
    %139 = memref.load %arg1[%c0_47] : memref<98xf32, #tpu.memory_space<smem>>
    %c49 = arith.constant 49 : index
    %140 = memref.load %arg1[%c49] : memref<98xf32, #tpu.memory_space<smem>>
    %141 = vector.broadcast %139 : f32 to vector<2x256xf32>
    %142 = vector.broadcast %140 : f32 to vector<2x256xf32>
    %143 = arith.select %9, %141, %142 : vector<2x256xi1>, vector<2x256xf32>
    %144 = arith.mulf %143, %137 : vector<2x256xf32>
    %cst_48 = arith.constant 0.000000e+00 : f32
    %145 = vector.broadcast %cst_48 : f32 to vector<2x256xf32>
    %146 = arith.select %138, %144, %145 : vector<2x256xi1>, vector<2x256xf32>
    %147 = arith.addf %136, %146 : vector<2x256xf32>
    %c50_i32 = arith.constant 50 : i32
    %148 = tpu.dynamic_rotate %3 by %c50_i32 dim 1 : vector<2x256xf32>, i32 -> vector<2x256xf32>
    %149 = arith.andi %18, %90 : vector<2x256xi1>
    %c1 = arith.constant 1 : index
    %150 = memref.load %arg1[%c1] : memref<98xf32, #tpu.memory_space<smem>>
    %c50 = arith.constant 50 : index
    %151 = memref.load %arg1[%c50] : memref<98xf32, #tpu.memory_space<smem>>
    %152 = vector.broadcast %150 : f32 to vector<2x256xf32>
    %153 = vector.broadcast %151 : f32 to vector<2x256xf32>
    %154 = arith.select %9, %152, %153 : vector<2x256xi1>, vector<2x256xf32>
    %155 = arith.mulf %154, %148 : vector<2x256xf32>
    %cst_49 = arith.constant 0.000000e+00 : f32
    %156 = vector.broadcast %cst_49 : f32 to vector<2x256xf32>
    %157 = arith.select %149, %155, %156 : vector<2x256xi1>, vector<2x256xf32>
    %158 = arith.addf %147, %157 : vector<2x256xf32>
    %c49_i32 = arith.constant 49 : i32
    %159 = tpu.dynamic_rotate %3 by %c49_i32 dim 1 : vector<2x256xf32>, i32 -> vector<2x256xf32>
    %160 = arith.andi %18, %99 : vector<2x256xi1>
    %c2 = arith.constant 2 : index
    %161 = memref.load %arg1[%c2] : memref<98xf32, #tpu.memory_space<smem>>
    %c51 = arith.constant 51 : index
    %162 = memref.load %arg1[%c51] : memref<98xf32, #tpu.memory_space<smem>>
    %163 = vector.broadcast %161 : f32 to vector<2x256xf32>
    %164 = vector.broadcast %162 : f32 to vector<2x256xf32>
    %165 = arith.select %9, %163, %164 : vector<2x256xi1>, vector<2x256xf32>
    %166 = arith.mulf %165, %159 : vector<2x256xf32>
    %cst_50 = arith.constant 0.000000e+00 : f32
    %167 = vector.broadcast %cst_50 : f32 to vector<2x256xf32>
    %168 = arith.select %160, %166, %167 : vector<2x256xi1>, vector<2x256xf32>
    %169 = arith.addf %158, %168 : vector<2x256xf32>
    %c48_i32_51 = arith.constant 48 : i32
    %170 = tpu.dynamic_rotate %3 by %c48_i32_51 dim 1 : vector<2x256xf32>, i32 -> vector<2x256xf32>
    %171 = arith.andi %18, %108 : vector<2x256xi1>
    %c3 = arith.constant 3 : index
    %172 = memref.load %arg1[%c3] : memref<98xf32, #tpu.memory_space<smem>>
    %c52 = arith.constant 52 : index
    %173 = memref.load %arg1[%c52] : memref<98xf32, #tpu.memory_space<smem>>
    %174 = vector.broadcast %172 : f32 to vector<2x256xf32>
    %175 = vector.broadcast %173 : f32 to vector<2x256xf32>
    %176 = arith.select %9, %174, %175 : vector<2x256xi1>, vector<2x256xf32>
    %177 = arith.mulf %176, %170 : vector<2x256xf32>
    %cst_52 = arith.constant 0.000000e+00 : f32
    %178 = vector.broadcast %cst_52 : f32 to vector<2x256xf32>
    %179 = arith.select %171, %177, %178 : vector<2x256xi1>, vector<2x256xf32>
    %180 = arith.addf %169, %179 : vector<2x256xf32>
    %c47_i32 = arith.constant 47 : i32
    %181 = tpu.dynamic_rotate %3 by %c47_i32 dim 1 : vector<2x256xf32>, i32 -> vector<2x256xf32>
    %182 = arith.andi %18, %117 : vector<2x256xi1>
    %c4 = arith.constant 4 : index
    %183 = memref.load %arg1[%c4] : memref<98xf32, #tpu.memory_space<smem>>
    %c53 = arith.constant 53 : index
    %184 = memref.load %arg1[%c53] : memref<98xf32, #tpu.memory_space<smem>>
    %185 = vector.broadcast %183 : f32 to vector<2x256xf32>
    %186 = vector.broadcast %184 : f32 to vector<2x256xf32>
    %187 = arith.select %9, %185, %186 : vector<2x256xi1>, vector<2x256xf32>
    %188 = arith.mulf %187, %181 : vector<2x256xf32>
    %cst_53 = arith.constant 0.000000e+00 : f32
    %189 = vector.broadcast %cst_53 : f32 to vector<2x256xf32>
    %190 = arith.select %182, %188, %189 : vector<2x256xi1>, vector<2x256xf32>
    %191 = arith.addf %180, %190 : vector<2x256xf32>
    %c46_i32 = arith.constant 46 : i32
    %192 = tpu.dynamic_rotate %3 by %c46_i32 dim 1 : vector<2x256xf32>, i32 -> vector<2x256xf32>
    %193 = arith.andi %18, %126 : vector<2x256xi1>
    %c5 = arith.constant 5 : index
    %194 = memref.load %arg1[%c5] : memref<98xf32, #tpu.memory_space<smem>>
    %c54 = arith.constant 54 : index
    %195 = memref.load %arg1[%c54] : memref<98xf32, #tpu.memory_space<smem>>
    %196 = vector.broadcast %194 : f32 to vector<2x256xf32>
    %197 = vector.broadcast %195 : f32 to vector<2x256xf32>
    %198 = arith.select %9, %196, %197 : vector<2x256xi1>, vector<2x256xf32>
    %199 = arith.mulf %198, %192 : vector<2x256xf32>
    %cst_54 = arith.constant 0.000000e+00 : f32
    %200 = vector.broadcast %cst_54 : f32 to vector<2x256xf32>
    %201 = arith.select %193, %199, %200 : vector<2x256xi1>, vector<2x256xf32>
    %202 = arith.addf %191, %201 : vector<2x256xf32>
    %c45_i32 = arith.constant 45 : i32
    %203 = tpu.dynamic_rotate %3 by %c45_i32 dim 1 : vector<2x256xf32>, i32 -> vector<2x256xf32>
    %204 = arith.andi %18, %135 : vector<2x256xi1>
    %c6 = arith.constant 6 : index
    %205 = memref.load %arg1[%c6] : memref<98xf32, #tpu.memory_space<smem>>
    %c55 = arith.constant 55 : index
    %206 = memref.load %arg1[%c55] : memref<98xf32, #tpu.memory_space<smem>>
    %207 = vector.broadcast %205 : f32 to vector<2x256xf32>
    %208 = vector.broadcast %206 : f32 to vector<2x256xf32>
    %209 = arith.select %9, %207, %208 : vector<2x256xi1>, vector<2x256xf32>
    %210 = arith.mulf %209, %203 : vector<2x256xf32>
    %cst_55 = arith.constant 0.000000e+00 : f32
    %211 = vector.broadcast %cst_55 : f32 to vector<2x256xf32>
    %212 = arith.select %204, %210, %211 : vector<2x256xi1>, vector<2x256xf32>
    %213 = arith.addf %202, %212 : vector<2x256xf32>
    %c35_i32 = arith.constant 35 : i32
    %214 = tpu.dynamic_rotate %3 by %c35_i32 dim 1 : vector<2x256xf32>, i32 -> vector<2x256xf32>
    %215 = arith.andi %27, %81 : vector<2x256xi1>
    %c7 = arith.constant 7 : index
    %216 = memref.load %arg1[%c7] : memref<98xf32, #tpu.memory_space<smem>>
    %c56 = arith.constant 56 : index
    %217 = memref.load %arg1[%c56] : memref<98xf32, #tpu.memory_space<smem>>
    %218 = vector.broadcast %216 : f32 to vector<2x256xf32>
    %219 = vector.broadcast %217 : f32 to vector<2x256xf32>
    %220 = arith.select %9, %218, %219 : vector<2x256xi1>, vector<2x256xf32>
    %221 = arith.mulf %220, %214 : vector<2x256xf32>
    %cst_56 = arith.constant 0.000000e+00 : f32
    %222 = vector.broadcast %cst_56 : f32 to vector<2x256xf32>
    %223 = arith.select %215, %221, %222 : vector<2x256xi1>, vector<2x256xf32>
    %224 = arith.addf %213, %223 : vector<2x256xf32>
    %c34_i32 = arith.constant 34 : i32
    %225 = tpu.dynamic_rotate %3 by %c34_i32 dim 1 : vector<2x256xf32>, i32 -> vector<2x256xf32>
    %226 = arith.andi %27, %90 : vector<2x256xi1>
    %c8 = arith.constant 8 : index
    %227 = memref.load %arg1[%c8] : memref<98xf32, #tpu.memory_space<smem>>
    %c57 = arith.constant 57 : index
    %228 = memref.load %arg1[%c57] : memref<98xf32, #tpu.memory_space<smem>>
    %229 = vector.broadcast %227 : f32 to vector<2x256xf32>
    %230 = vector.broadcast %228 : f32 to vector<2x256xf32>
    %231 = arith.select %9, %229, %230 : vector<2x256xi1>, vector<2x256xf32>
    %232 = arith.mulf %231, %225 : vector<2x256xf32>
    %cst_57 = arith.constant 0.000000e+00 : f32
    %233 = vector.broadcast %cst_57 : f32 to vector<2x256xf32>
    %234 = arith.select %226, %232, %233 : vector<2x256xi1>, vector<2x256xf32>
    %235 = arith.addf %224, %234 : vector<2x256xf32>
    %c33_i32 = arith.constant 33 : i32
    %236 = tpu.dynamic_rotate %3 by %c33_i32 dim 1 : vector<2x256xf32>, i32 -> vector<2x256xf32>
    %237 = arith.andi %27, %99 : vector<2x256xi1>
    %c9 = arith.constant 9 : index
    %238 = memref.load %arg1[%c9] : memref<98xf32, #tpu.memory_space<smem>>
    %c58 = arith.constant 58 : index
    %239 = memref.load %arg1[%c58] : memref<98xf32, #tpu.memory_space<smem>>
    %240 = vector.broadcast %238 : f32 to vector<2x256xf32>
    %241 = vector.broadcast %239 : f32 to vector<2x256xf32>
    %242 = arith.select %9, %240, %241 : vector<2x256xi1>, vector<2x256xf32>
    %243 = arith.mulf %242, %236 : vector<2x256xf32>
    %cst_58 = arith.constant 0.000000e+00 : f32
    %244 = vector.broadcast %cst_58 : f32 to vector<2x256xf32>
    %245 = arith.select %237, %243, %244 : vector<2x256xi1>, vector<2x256xf32>
    %246 = arith.addf %235, %245 : vector<2x256xf32>
    %c32_i32_59 = arith.constant 32 : i32
    %247 = tpu.dynamic_rotate %3 by %c32_i32_59 dim 1 : vector<2x256xf32>, i32 -> vector<2x256xf32>
    %248 = arith.andi %27, %108 : vector<2x256xi1>
    %c10 = arith.constant 10 : index
    %249 = memref.load %arg1[%c10] : memref<98xf32, #tpu.memory_space<smem>>
    %c59 = arith.constant 59 : index
    %250 = memref.load %arg1[%c59] : memref<98xf32, #tpu.memory_space<smem>>
    %251 = vector.broadcast %249 : f32 to vector<2x256xf32>
    %252 = vector.broadcast %250 : f32 to vector<2x256xf32>
    %253 = arith.select %9, %251, %252 : vector<2x256xi1>, vector<2x256xf32>
    %254 = arith.mulf %253, %247 : vector<2x256xf32>
    %cst_60 = arith.constant 0.000000e+00 : f32
    %255 = vector.broadcast %cst_60 : f32 to vector<2x256xf32>
    %256 = arith.select %248, %254, %255 : vector<2x256xi1>, vector<2x256xf32>
    %257 = arith.addf %246, %256 : vector<2x256xf32>
    %c31_i32 = arith.constant 31 : i32
    %258 = tpu.dynamic_rotate %3 by %c31_i32 dim 1 : vector<2x256xf32>, i32 -> vector<2x256xf32>
    %259 = arith.andi %27, %117 : vector<2x256xi1>
    %c11 = arith.constant 11 : index
    %260 = memref.load %arg1[%c11] : memref<98xf32, #tpu.memory_space<smem>>
    %c60 = arith.constant 60 : index
    %261 = memref.load %arg1[%c60] : memref<98xf32, #tpu.memory_space<smem>>
    %262 = vector.broadcast %260 : f32 to vector<2x256xf32>
    %263 = vector.broadcast %261 : f32 to vector<2x256xf32>
    %264 = arith.select %9, %262, %263 : vector<2x256xi1>, vector<2x256xf32>
    %265 = arith.mulf %264, %258 : vector<2x256xf32>
    %cst_61 = arith.constant 0.000000e+00 : f32
    %266 = vector.broadcast %cst_61 : f32 to vector<2x256xf32>
    %267 = arith.select %259, %265, %266 : vector<2x256xi1>, vector<2x256xf32>
    %268 = arith.addf %257, %267 : vector<2x256xf32>
    %c30_i32 = arith.constant 30 : i32
    %269 = tpu.dynamic_rotate %3 by %c30_i32 dim 1 : vector<2x256xf32>, i32 -> vector<2x256xf32>
    %270 = arith.andi %27, %126 : vector<2x256xi1>
    %c12 = arith.constant 12 : index
    %271 = memref.load %arg1[%c12] : memref<98xf32, #tpu.memory_space<smem>>
    %c61 = arith.constant 61 : index
    %272 = memref.load %arg1[%c61] : memref<98xf32, #tpu.memory_space<smem>>
    %273 = vector.broadcast %271 : f32 to vector<2x256xf32>
    %274 = vector.broadcast %272 : f32 to vector<2x256xf32>
    %275 = arith.select %9, %273, %274 : vector<2x256xi1>, vector<2x256xf32>
    %276 = arith.mulf %275, %269 : vector<2x256xf32>
    %cst_62 = arith.constant 0.000000e+00 : f32
    %277 = vector.broadcast %cst_62 : f32 to vector<2x256xf32>
    %278 = arith.select %270, %276, %277 : vector<2x256xi1>, vector<2x256xf32>
    %279 = arith.addf %268, %278 : vector<2x256xf32>
    %c29_i32 = arith.constant 29 : i32
    %280 = tpu.dynamic_rotate %3 by %c29_i32 dim 1 : vector<2x256xf32>, i32 -> vector<2x256xf32>
    %281 = arith.andi %27, %135 : vector<2x256xi1>
    %c13 = arith.constant 13 : index
    %282 = memref.load %arg1[%c13] : memref<98xf32, #tpu.memory_space<smem>>
    %c62 = arith.constant 62 : index
    %283 = memref.load %arg1[%c62] : memref<98xf32, #tpu.memory_space<smem>>
    %284 = vector.broadcast %282 : f32 to vector<2x256xf32>
    %285 = vector.broadcast %283 : f32 to vector<2x256xf32>
    %286 = arith.select %9, %284, %285 : vector<2x256xi1>, vector<2x256xf32>
    %287 = arith.mulf %286, %280 : vector<2x256xf32>
    %cst_63 = arith.constant 0.000000e+00 : f32
    %288 = vector.broadcast %cst_63 : f32 to vector<2x256xf32>
    %289 = arith.select %281, %287, %288 : vector<2x256xi1>, vector<2x256xf32>
    %290 = arith.addf %279, %289 : vector<2x256xf32>
    %c19_i32 = arith.constant 19 : i32
    %291 = tpu.dynamic_rotate %3 by %c19_i32 dim 1 : vector<2x256xf32>, i32 -> vector<2x256xf32>
    %292 = arith.andi %36, %81 : vector<2x256xi1>
    %c14 = arith.constant 14 : index
    %293 = memref.load %arg1[%c14] : memref<98xf32, #tpu.memory_space<smem>>
    %c63 = arith.constant 63 : index
    %294 = memref.load %arg1[%c63] : memref<98xf32, #tpu.memory_space<smem>>
    %295 = vector.broadcast %293 : f32 to vector<2x256xf32>
    %296 = vector.broadcast %294 : f32 to vector<2x256xf32>
    %297 = arith.select %9, %295, %296 : vector<2x256xi1>, vector<2x256xf32>
    %298 = arith.mulf %297, %291 : vector<2x256xf32>
    %cst_64 = arith.constant 0.000000e+00 : f32
    %299 = vector.broadcast %cst_64 : f32 to vector<2x256xf32>
    %300 = arith.select %292, %298, %299 : vector<2x256xi1>, vector<2x256xf32>
    %301 = arith.addf %290, %300 : vector<2x256xf32>
    %c18_i32 = arith.constant 18 : i32
    %302 = tpu.dynamic_rotate %3 by %c18_i32 dim 1 : vector<2x256xf32>, i32 -> vector<2x256xf32>
    %303 = arith.andi %36, %90 : vector<2x256xi1>
    %c15 = arith.constant 15 : index
    %304 = memref.load %arg1[%c15] : memref<98xf32, #tpu.memory_space<smem>>
    %c64 = arith.constant 64 : index
    %305 = memref.load %arg1[%c64] : memref<98xf32, #tpu.memory_space<smem>>
    %306 = vector.broadcast %304 : f32 to vector<2x256xf32>
    %307 = vector.broadcast %305 : f32 to vector<2x256xf32>
    %308 = arith.select %9, %306, %307 : vector<2x256xi1>, vector<2x256xf32>
    %309 = arith.mulf %308, %302 : vector<2x256xf32>
    %cst_65 = arith.constant 0.000000e+00 : f32
    %310 = vector.broadcast %cst_65 : f32 to vector<2x256xf32>
    %311 = arith.select %303, %309, %310 : vector<2x256xi1>, vector<2x256xf32>
    %312 = arith.addf %301, %311 : vector<2x256xf32>
    %c17_i32 = arith.constant 17 : i32
    %313 = tpu.dynamic_rotate %3 by %c17_i32 dim 1 : vector<2x256xf32>, i32 -> vector<2x256xf32>
    %314 = arith.andi %36, %99 : vector<2x256xi1>
    %c16 = arith.constant 16 : index
    %315 = memref.load %arg1[%c16] : memref<98xf32, #tpu.memory_space<smem>>
    %c65 = arith.constant 65 : index
    %316 = memref.load %arg1[%c65] : memref<98xf32, #tpu.memory_space<smem>>
    %317 = vector.broadcast %315 : f32 to vector<2x256xf32>
    %318 = vector.broadcast %316 : f32 to vector<2x256xf32>
    %319 = arith.select %9, %317, %318 : vector<2x256xi1>, vector<2x256xf32>
    %320 = arith.mulf %319, %313 : vector<2x256xf32>
    %cst_66 = arith.constant 0.000000e+00 : f32
    %321 = vector.broadcast %cst_66 : f32 to vector<2x256xf32>
    %322 = arith.select %314, %320, %321 : vector<2x256xi1>, vector<2x256xf32>
    %323 = arith.addf %312, %322 : vector<2x256xf32>
    %c16_i32_67 = arith.constant 16 : i32
    %324 = tpu.dynamic_rotate %3 by %c16_i32_67 dim 1 : vector<2x256xf32>, i32 -> vector<2x256xf32>
    %325 = arith.andi %36, %108 : vector<2x256xi1>
    %c17 = arith.constant 17 : index
    %326 = memref.load %arg1[%c17] : memref<98xf32, #tpu.memory_space<smem>>
    %c66 = arith.constant 66 : index
    %327 = memref.load %arg1[%c66] : memref<98xf32, #tpu.memory_space<smem>>
    %328 = vector.broadcast %326 : f32 to vector<2x256xf32>
    %329 = vector.broadcast %327 : f32 to vector<2x256xf32>
    %330 = arith.select %9, %328, %329 : vector<2x256xi1>, vector<2x256xf32>
    %331 = arith.mulf %330, %324 : vector<2x256xf32>
    %cst_68 = arith.constant 0.000000e+00 : f32
    %332 = vector.broadcast %cst_68 : f32 to vector<2x256xf32>
    %333 = arith.select %325, %331, %332 : vector<2x256xi1>, vector<2x256xf32>
    %334 = arith.addf %323, %333 : vector<2x256xf32>
    %c15_i32_69 = arith.constant 15 : i32
    %335 = tpu.dynamic_rotate %3 by %c15_i32_69 dim 1 : vector<2x256xf32>, i32 -> vector<2x256xf32>
    %336 = arith.andi %36, %117 : vector<2x256xi1>
    %c18 = arith.constant 18 : index
    %337 = memref.load %arg1[%c18] : memref<98xf32, #tpu.memory_space<smem>>
    %c67 = arith.constant 67 : index
    %338 = memref.load %arg1[%c67] : memref<98xf32, #tpu.memory_space<smem>>
    %339 = vector.broadcast %337 : f32 to vector<2x256xf32>
    %340 = vector.broadcast %338 : f32 to vector<2x256xf32>
    %341 = arith.select %9, %339, %340 : vector<2x256xi1>, vector<2x256xf32>
    %342 = arith.mulf %341, %335 : vector<2x256xf32>
    %cst_70 = arith.constant 0.000000e+00 : f32
    %343 = vector.broadcast %cst_70 : f32 to vector<2x256xf32>
    %344 = arith.select %336, %342, %343 : vector<2x256xi1>, vector<2x256xf32>
    %345 = arith.addf %334, %344 : vector<2x256xf32>
    %c14_i32 = arith.constant 14 : i32
    %346 = tpu.dynamic_rotate %3 by %c14_i32 dim 1 : vector<2x256xf32>, i32 -> vector<2x256xf32>
    %347 = arith.andi %36, %126 : vector<2x256xi1>
    %c19 = arith.constant 19 : index
    %348 = memref.load %arg1[%c19] : memref<98xf32, #tpu.memory_space<smem>>
    %c68 = arith.constant 68 : index
    %349 = memref.load %arg1[%c68] : memref<98xf32, #tpu.memory_space<smem>>
    %350 = vector.broadcast %348 : f32 to vector<2x256xf32>
    %351 = vector.broadcast %349 : f32 to vector<2x256xf32>
    %352 = arith.select %9, %350, %351 : vector<2x256xi1>, vector<2x256xf32>
    %353 = arith.mulf %352, %346 : vector<2x256xf32>
    %cst_71 = arith.constant 0.000000e+00 : f32
    %354 = vector.broadcast %cst_71 : f32 to vector<2x256xf32>
    %355 = arith.select %347, %353, %354 : vector<2x256xi1>, vector<2x256xf32>
    %356 = arith.addf %345, %355 : vector<2x256xf32>
    %c13_i32 = arith.constant 13 : i32
    %357 = tpu.dynamic_rotate %3 by %c13_i32 dim 1 : vector<2x256xf32>, i32 -> vector<2x256xf32>
    %358 = arith.andi %36, %135 : vector<2x256xi1>
    %c20 = arith.constant 20 : index
    %359 = memref.load %arg1[%c20] : memref<98xf32, #tpu.memory_space<smem>>
    %c69 = arith.constant 69 : index
    %360 = memref.load %arg1[%c69] : memref<98xf32, #tpu.memory_space<smem>>
    %361 = vector.broadcast %359 : f32 to vector<2x256xf32>
    %362 = vector.broadcast %360 : f32 to vector<2x256xf32>
    %363 = arith.select %9, %361, %362 : vector<2x256xi1>, vector<2x256xf32>
    %364 = arith.mulf %363, %357 : vector<2x256xf32>
    %cst_72 = arith.constant 0.000000e+00 : f32
    %365 = vector.broadcast %cst_72 : f32 to vector<2x256xf32>
    %366 = arith.select %358, %364, %365 : vector<2x256xi1>, vector<2x256xf32>
    %367 = arith.addf %356, %366 : vector<2x256xf32>
    %c3_i32_73 = arith.constant 3 : i32
    %368 = tpu.dynamic_rotate %3 by %c3_i32_73 dim 1 : vector<2x256xf32>, i32 -> vector<2x256xf32>
    %369 = arith.andi %45, %81 : vector<2x256xi1>
    %c21 = arith.constant 21 : index
    %370 = memref.load %arg1[%c21] : memref<98xf32, #tpu.memory_space<smem>>
    %c70 = arith.constant 70 : index
    %371 = memref.load %arg1[%c70] : memref<98xf32, #tpu.memory_space<smem>>
    %372 = vector.broadcast %370 : f32 to vector<2x256xf32>
    %373 = vector.broadcast %371 : f32 to vector<2x256xf32>
    %374 = arith.select %9, %372, %373 : vector<2x256xi1>, vector<2x256xf32>
    %375 = arith.mulf %374, %368 : vector<2x256xf32>
    %cst_74 = arith.constant 0.000000e+00 : f32
    %376 = vector.broadcast %cst_74 : f32 to vector<2x256xf32>
    %377 = arith.select %369, %375, %376 : vector<2x256xi1>, vector<2x256xf32>
    %378 = arith.addf %367, %377 : vector<2x256xf32>
    %c2_i32_75 = arith.constant 2 : i32
    %379 = tpu.dynamic_rotate %3 by %c2_i32_75 dim 1 : vector<2x256xf32>, i32 -> vector<2x256xf32>
    %380 = arith.andi %45, %90 : vector<2x256xi1>
    %c22 = arith.constant 22 : index
    %381 = memref.load %arg1[%c22] : memref<98xf32, #tpu.memory_space<smem>>
    %c71 = arith.constant 71 : index
    %382 = memref.load %arg1[%c71] : memref<98xf32, #tpu.memory_space<smem>>
    %383 = vector.broadcast %381 : f32 to vector<2x256xf32>
    %384 = vector.broadcast %382 : f32 to vector<2x256xf32>
    %385 = arith.select %9, %383, %384 : vector<2x256xi1>, vector<2x256xf32>
    %386 = arith.mulf %385, %379 : vector<2x256xf32>
    %cst_76 = arith.constant 0.000000e+00 : f32
    %387 = vector.broadcast %cst_76 : f32 to vector<2x256xf32>
    %388 = arith.select %380, %386, %387 : vector<2x256xi1>, vector<2x256xf32>
    %389 = arith.addf %378, %388 : vector<2x256xf32>
    %c1_i32_77 = arith.constant 1 : i32
    %390 = tpu.dynamic_rotate %3 by %c1_i32_77 dim 1 : vector<2x256xf32>, i32 -> vector<2x256xf32>
    %391 = arith.andi %45, %99 : vector<2x256xi1>
    %c23 = arith.constant 23 : index
    %392 = memref.load %arg1[%c23] : memref<98xf32, #tpu.memory_space<smem>>
    %c72 = arith.constant 72 : index
    %393 = memref.load %arg1[%c72] : memref<98xf32, #tpu.memory_space<smem>>
    %394 = vector.broadcast %392 : f32 to vector<2x256xf32>
    %395 = vector.broadcast %393 : f32 to vector<2x256xf32>
    %396 = arith.select %9, %394, %395 : vector<2x256xi1>, vector<2x256xf32>
    %397 = arith.mulf %396, %390 : vector<2x256xf32>
    %cst_78 = arith.constant 0.000000e+00 : f32
    %398 = vector.broadcast %cst_78 : f32 to vector<2x256xf32>
    %399 = arith.select %391, %397, %398 : vector<2x256xi1>, vector<2x256xf32>
    %400 = arith.addf %389, %399 : vector<2x256xf32>
    %401 = arith.andi %45, %108 : vector<2x256xi1>
    %c24 = arith.constant 24 : index
    %402 = memref.load %arg1[%c24] : memref<98xf32, #tpu.memory_space<smem>>
    %c73 = arith.constant 73 : index
    %403 = memref.load %arg1[%c73] : memref<98xf32, #tpu.memory_space<smem>>
    %404 = vector.broadcast %402 : f32 to vector<2x256xf32>
    %405 = vector.broadcast %403 : f32 to vector<2x256xf32>
    %406 = arith.select %9, %404, %405 : vector<2x256xi1>, vector<2x256xf32>
    %407 = arith.mulf %406, %3 : vector<2x256xf32>
    %cst_79 = arith.constant 0.000000e+00 : f32
    %408 = vector.broadcast %cst_79 : f32 to vector<2x256xf32>
    %409 = arith.select %401, %407, %408 : vector<2x256xi1>, vector<2x256xf32>
    %410 = arith.addf %400, %409 : vector<2x256xf32>
    %c255_i32 = arith.constant 255 : i32
    %411 = tpu.dynamic_rotate %3 by %c255_i32 dim 1 : vector<2x256xf32>, i32 -> vector<2x256xf32>
    %412 = arith.andi %45, %117 : vector<2x256xi1>
    %c25 = arith.constant 25 : index
    %413 = memref.load %arg1[%c25] : memref<98xf32, #tpu.memory_space<smem>>
    %c74 = arith.constant 74 : index
    %414 = memref.load %arg1[%c74] : memref<98xf32, #tpu.memory_space<smem>>
    %415 = vector.broadcast %413 : f32 to vector<2x256xf32>
    %416 = vector.broadcast %414 : f32 to vector<2x256xf32>
    %417 = arith.select %9, %415, %416 : vector<2x256xi1>, vector<2x256xf32>
    %418 = arith.mulf %417, %411 : vector<2x256xf32>
    %cst_80 = arith.constant 0.000000e+00 : f32
    %419 = vector.broadcast %cst_80 : f32 to vector<2x256xf32>
    %420 = arith.select %412, %418, %419 : vector<2x256xi1>, vector<2x256xf32>
    %421 = arith.addf %410, %420 : vector<2x256xf32>
    %c254_i32 = arith.constant 254 : i32
    %422 = tpu.dynamic_rotate %3 by %c254_i32 dim 1 : vector<2x256xf32>, i32 -> vector<2x256xf32>
    %423 = arith.andi %45, %126 : vector<2x256xi1>
    %c26 = arith.constant 26 : index
    %424 = memref.load %arg1[%c26] : memref<98xf32, #tpu.memory_space<smem>>
    %c75 = arith.constant 75 : index
    %425 = memref.load %arg1[%c75] : memref<98xf32, #tpu.memory_space<smem>>
    %426 = vector.broadcast %424 : f32 to vector<2x256xf32>
    %427 = vector.broadcast %425 : f32 to vector<2x256xf32>
    %428 = arith.select %9, %426, %427 : vector<2x256xi1>, vector<2x256xf32>
    %429 = arith.mulf %428, %422 : vector<2x256xf32>
    %cst_81 = arith.constant 0.000000e+00 : f32
    %430 = vector.broadcast %cst_81 : f32 to vector<2x256xf32>
    %431 = arith.select %423, %429, %430 : vector<2x256xi1>, vector<2x256xf32>
    %432 = arith.addf %421, %431 : vector<2x256xf32>
    %c253_i32 = arith.constant 253 : i32
    %433 = tpu.dynamic_rotate %3 by %c253_i32 dim 1 : vector<2x256xf32>, i32 -> vector<2x256xf32>
    %434 = arith.andi %45, %135 : vector<2x256xi1>
    %c27 = arith.constant 27 : index
    %435 = memref.load %arg1[%c27] : memref<98xf32, #tpu.memory_space<smem>>
    %c76 = arith.constant 76 : index
    %436 = memref.load %arg1[%c76] : memref<98xf32, #tpu.memory_space<smem>>
    %437 = vector.broadcast %435 : f32 to vector<2x256xf32>
    %438 = vector.broadcast %436 : f32 to vector<2x256xf32>
    %439 = arith.select %9, %437, %438 : vector<2x256xi1>, vector<2x256xf32>
    %440 = arith.mulf %439, %433 : vector<2x256xf32>
    %cst_82 = arith.constant 0.000000e+00 : f32
    %441 = vector.broadcast %cst_82 : f32 to vector<2x256xf32>
    %442 = arith.select %434, %440, %441 : vector<2x256xi1>, vector<2x256xf32>
    %443 = arith.addf %432, %442 : vector<2x256xf32>
    %c243_i32 = arith.constant 243 : i32
    %444 = tpu.dynamic_rotate %3 by %c243_i32 dim 1 : vector<2x256xf32>, i32 -> vector<2x256xf32>
    %445 = arith.andi %54, %81 : vector<2x256xi1>
    %c28 = arith.constant 28 : index
    %446 = memref.load %arg1[%c28] : memref<98xf32, #tpu.memory_space<smem>>
    %c77 = arith.constant 77 : index
    %447 = memref.load %arg1[%c77] : memref<98xf32, #tpu.memory_space<smem>>
    %448 = vector.broadcast %446 : f32 to vector<2x256xf32>
    %449 = vector.broadcast %447 : f32 to vector<2x256xf32>
    %450 = arith.select %9, %448, %449 : vector<2x256xi1>, vector<2x256xf32>
    %451 = arith.mulf %450, %444 : vector<2x256xf32>
    %cst_83 = arith.constant 0.000000e+00 : f32
    %452 = vector.broadcast %cst_83 : f32 to vector<2x256xf32>
    %453 = arith.select %445, %451, %452 : vector<2x256xi1>, vector<2x256xf32>
    %454 = arith.addf %443, %453 : vector<2x256xf32>
    %c242_i32 = arith.constant 242 : i32
    %455 = tpu.dynamic_rotate %3 by %c242_i32 dim 1 : vector<2x256xf32>, i32 -> vector<2x256xf32>
    %456 = arith.andi %54, %90 : vector<2x256xi1>
    %c29 = arith.constant 29 : index
    %457 = memref.load %arg1[%c29] : memref<98xf32, #tpu.memory_space<smem>>
    %c78 = arith.constant 78 : index
    %458 = memref.load %arg1[%c78] : memref<98xf32, #tpu.memory_space<smem>>
    %459 = vector.broadcast %457 : f32 to vector<2x256xf32>
    %460 = vector.broadcast %458 : f32 to vector<2x256xf32>
    %461 = arith.select %9, %459, %460 : vector<2x256xi1>, vector<2x256xf32>
    %462 = arith.mulf %461, %455 : vector<2x256xf32>
    %cst_84 = arith.constant 0.000000e+00 : f32
    %463 = vector.broadcast %cst_84 : f32 to vector<2x256xf32>
    %464 = arith.select %456, %462, %463 : vector<2x256xi1>, vector<2x256xf32>
    %465 = arith.addf %454, %464 : vector<2x256xf32>
    %c241_i32 = arith.constant 241 : i32
    %466 = tpu.dynamic_rotate %3 by %c241_i32 dim 1 : vector<2x256xf32>, i32 -> vector<2x256xf32>
    %467 = arith.andi %54, %99 : vector<2x256xi1>
    %c30 = arith.constant 30 : index
    %468 = memref.load %arg1[%c30] : memref<98xf32, #tpu.memory_space<smem>>
    %c79 = arith.constant 79 : index
    %469 = memref.load %arg1[%c79] : memref<98xf32, #tpu.memory_space<smem>>
    %470 = vector.broadcast %468 : f32 to vector<2x256xf32>
    %471 = vector.broadcast %469 : f32 to vector<2x256xf32>
    %472 = arith.select %9, %470, %471 : vector<2x256xi1>, vector<2x256xf32>
    %473 = arith.mulf %472, %466 : vector<2x256xf32>
    %cst_85 = arith.constant 0.000000e+00 : f32
    %474 = vector.broadcast %cst_85 : f32 to vector<2x256xf32>
    %475 = arith.select %467, %473, %474 : vector<2x256xi1>, vector<2x256xf32>
    %476 = arith.addf %465, %475 : vector<2x256xf32>
    %c240_i32 = arith.constant 240 : i32
    %477 = tpu.dynamic_rotate %3 by %c240_i32 dim 1 : vector<2x256xf32>, i32 -> vector<2x256xf32>
    %478 = arith.andi %54, %108 : vector<2x256xi1>
    %c31 = arith.constant 31 : index
    %479 = memref.load %arg1[%c31] : memref<98xf32, #tpu.memory_space<smem>>
    %c80 = arith.constant 80 : index
    %480 = memref.load %arg1[%c80] : memref<98xf32, #tpu.memory_space<smem>>
    %481 = vector.broadcast %479 : f32 to vector<2x256xf32>
    %482 = vector.broadcast %480 : f32 to vector<2x256xf32>
    %483 = arith.select %9, %481, %482 : vector<2x256xi1>, vector<2x256xf32>
    %484 = arith.mulf %483, %477 : vector<2x256xf32>
    %cst_86 = arith.constant 0.000000e+00 : f32
    %485 = vector.broadcast %cst_86 : f32 to vector<2x256xf32>
    %486 = arith.select %478, %484, %485 : vector<2x256xi1>, vector<2x256xf32>
    %487 = arith.addf %476, %486 : vector<2x256xf32>
    %c239_i32 = arith.constant 239 : i32
    %488 = tpu.dynamic_rotate %3 by %c239_i32 dim 1 : vector<2x256xf32>, i32 -> vector<2x256xf32>
    %489 = arith.andi %54, %117 : vector<2x256xi1>
    %c32 = arith.constant 32 : index
    %490 = memref.load %arg1[%c32] : memref<98xf32, #tpu.memory_space<smem>>
    %c81 = arith.constant 81 : index
    %491 = memref.load %arg1[%c81] : memref<98xf32, #tpu.memory_space<smem>>
    %492 = vector.broadcast %490 : f32 to vector<2x256xf32>
    %493 = vector.broadcast %491 : f32 to vector<2x256xf32>
    %494 = arith.select %9, %492, %493 : vector<2x256xi1>, vector<2x256xf32>
    %495 = arith.mulf %494, %488 : vector<2x256xf32>
    %cst_87 = arith.constant 0.000000e+00 : f32
    %496 = vector.broadcast %cst_87 : f32 to vector<2x256xf32>
    %497 = arith.select %489, %495, %496 : vector<2x256xi1>, vector<2x256xf32>
    %498 = arith.addf %487, %497 : vector<2x256xf32>
    %c238_i32 = arith.constant 238 : i32
    %499 = tpu.dynamic_rotate %3 by %c238_i32 dim 1 : vector<2x256xf32>, i32 -> vector<2x256xf32>
    %500 = arith.andi %54, %126 : vector<2x256xi1>
    %c33 = arith.constant 33 : index
    %501 = memref.load %arg1[%c33] : memref<98xf32, #tpu.memory_space<smem>>
    %c82 = arith.constant 82 : index
    %502 = memref.load %arg1[%c82] : memref<98xf32, #tpu.memory_space<smem>>
    %503 = vector.broadcast %501 : f32 to vector<2x256xf32>
    %504 = vector.broadcast %502 : f32 to vector<2x256xf32>
    %505 = arith.select %9, %503, %504 : vector<2x256xi1>, vector<2x256xf32>
    %506 = arith.mulf %505, %499 : vector<2x256xf32>
    %cst_88 = arith.constant 0.000000e+00 : f32
    %507 = vector.broadcast %cst_88 : f32 to vector<2x256xf32>
    %508 = arith.select %500, %506, %507 : vector<2x256xi1>, vector<2x256xf32>
    %509 = arith.addf %498, %508 : vector<2x256xf32>
    %c237_i32 = arith.constant 237 : i32
    %510 = tpu.dynamic_rotate %3 by %c237_i32 dim 1 : vector<2x256xf32>, i32 -> vector<2x256xf32>
    %511 = arith.andi %54, %135 : vector<2x256xi1>
    %c34 = arith.constant 34 : index
    %512 = memref.load %arg1[%c34] : memref<98xf32, #tpu.memory_space<smem>>
    %c83 = arith.constant 83 : index
    %513 = memref.load %arg1[%c83] : memref<98xf32, #tpu.memory_space<smem>>
    %514 = vector.broadcast %512 : f32 to vector<2x256xf32>
    %515 = vector.broadcast %513 : f32 to vector<2x256xf32>
    %516 = arith.select %9, %514, %515 : vector<2x256xi1>, vector<2x256xf32>
    %517 = arith.mulf %516, %510 : vector<2x256xf32>
    %cst_89 = arith.constant 0.000000e+00 : f32
    %518 = vector.broadcast %cst_89 : f32 to vector<2x256xf32>
    %519 = arith.select %511, %517, %518 : vector<2x256xi1>, vector<2x256xf32>
    %520 = arith.addf %509, %519 : vector<2x256xf32>
    %c227_i32 = arith.constant 227 : i32
    %521 = tpu.dynamic_rotate %3 by %c227_i32 dim 1 : vector<2x256xf32>, i32 -> vector<2x256xf32>
    %522 = arith.andi %63, %81 : vector<2x256xi1>
    %c35 = arith.constant 35 : index
    %523 = memref.load %arg1[%c35] : memref<98xf32, #tpu.memory_space<smem>>
    %c84 = arith.constant 84 : index
    %524 = memref.load %arg1[%c84] : memref<98xf32, #tpu.memory_space<smem>>
    %525 = vector.broadcast %523 : f32 to vector<2x256xf32>
    %526 = vector.broadcast %524 : f32 to vector<2x256xf32>
    %527 = arith.select %9, %525, %526 : vector<2x256xi1>, vector<2x256xf32>
    %528 = arith.mulf %527, %521 : vector<2x256xf32>
    %cst_90 = arith.constant 0.000000e+00 : f32
    %529 = vector.broadcast %cst_90 : f32 to vector<2x256xf32>
    %530 = arith.select %522, %528, %529 : vector<2x256xi1>, vector<2x256xf32>
    %531 = arith.addf %520, %530 : vector<2x256xf32>
    %c226_i32 = arith.constant 226 : i32
    %532 = tpu.dynamic_rotate %3 by %c226_i32 dim 1 : vector<2x256xf32>, i32 -> vector<2x256xf32>
    %533 = arith.andi %63, %90 : vector<2x256xi1>
    %c36 = arith.constant 36 : index
    %534 = memref.load %arg1[%c36] : memref<98xf32, #tpu.memory_space<smem>>
    %c85 = arith.constant 85 : index
    %535 = memref.load %arg1[%c85] : memref<98xf32, #tpu.memory_space<smem>>
    %536 = vector.broadcast %534 : f32 to vector<2x256xf32>
    %537 = vector.broadcast %535 : f32 to vector<2x256xf32>
    %538 = arith.select %9, %536, %537 : vector<2x256xi1>, vector<2x256xf32>
    %539 = arith.mulf %538, %532 : vector<2x256xf32>
    %cst_91 = arith.constant 0.000000e+00 : f32
    %540 = vector.broadcast %cst_91 : f32 to vector<2x256xf32>
    %541 = arith.select %533, %539, %540 : vector<2x256xi1>, vector<2x256xf32>
    %542 = arith.addf %531, %541 : vector<2x256xf32>
    %c225_i32 = arith.constant 225 : i32
    %543 = tpu.dynamic_rotate %3 by %c225_i32 dim 1 : vector<2x256xf32>, i32 -> vector<2x256xf32>
    %544 = arith.andi %63, %99 : vector<2x256xi1>
    %c37 = arith.constant 37 : index
    %545 = memref.load %arg1[%c37] : memref<98xf32, #tpu.memory_space<smem>>
    %c86 = arith.constant 86 : index
    %546 = memref.load %arg1[%c86] : memref<98xf32, #tpu.memory_space<smem>>
    %547 = vector.broadcast %545 : f32 to vector<2x256xf32>
    %548 = vector.broadcast %546 : f32 to vector<2x256xf32>
    %549 = arith.select %9, %547, %548 : vector<2x256xi1>, vector<2x256xf32>
    %550 = arith.mulf %549, %543 : vector<2x256xf32>
    %cst_92 = arith.constant 0.000000e+00 : f32
    %551 = vector.broadcast %cst_92 : f32 to vector<2x256xf32>
    %552 = arith.select %544, %550, %551 : vector<2x256xi1>, vector<2x256xf32>
    %553 = arith.addf %542, %552 : vector<2x256xf32>
    %c224_i32 = arith.constant 224 : i32
    %554 = tpu.dynamic_rotate %3 by %c224_i32 dim 1 : vector<2x256xf32>, i32 -> vector<2x256xf32>
    %555 = arith.andi %63, %108 : vector<2x256xi1>
    %c38 = arith.constant 38 : index
    %556 = memref.load %arg1[%c38] : memref<98xf32, #tpu.memory_space<smem>>
    %c87 = arith.constant 87 : index
    %557 = memref.load %arg1[%c87] : memref<98xf32, #tpu.memory_space<smem>>
    %558 = vector.broadcast %556 : f32 to vector<2x256xf32>
    %559 = vector.broadcast %557 : f32 to vector<2x256xf32>
    %560 = arith.select %9, %558, %559 : vector<2x256xi1>, vector<2x256xf32>
    %561 = arith.mulf %560, %554 : vector<2x256xf32>
    %cst_93 = arith.constant 0.000000e+00 : f32
    %562 = vector.broadcast %cst_93 : f32 to vector<2x256xf32>
    %563 = arith.select %555, %561, %562 : vector<2x256xi1>, vector<2x256xf32>
    %564 = arith.addf %553, %563 : vector<2x256xf32>
    %c223_i32 = arith.constant 223 : i32
    %565 = tpu.dynamic_rotate %3 by %c223_i32 dim 1 : vector<2x256xf32>, i32 -> vector<2x256xf32>
    %566 = arith.andi %63, %117 : vector<2x256xi1>
    %c39 = arith.constant 39 : index
    %567 = memref.load %arg1[%c39] : memref<98xf32, #tpu.memory_space<smem>>
    %c88 = arith.constant 88 : index
    %568 = memref.load %arg1[%c88] : memref<98xf32, #tpu.memory_space<smem>>
    %569 = vector.broadcast %567 : f32 to vector<2x256xf32>
    %570 = vector.broadcast %568 : f32 to vector<2x256xf32>
    %571 = arith.select %9, %569, %570 : vector<2x256xi1>, vector<2x256xf32>
    %572 = arith.mulf %571, %565 : vector<2x256xf32>
    %cst_94 = arith.constant 0.000000e+00 : f32
    %573 = vector.broadcast %cst_94 : f32 to vector<2x256xf32>
    %574 = arith.select %566, %572, %573 : vector<2x256xi1>, vector<2x256xf32>
    %575 = arith.addf %564, %574 : vector<2x256xf32>
    %c222_i32 = arith.constant 222 : i32
    %576 = tpu.dynamic_rotate %3 by %c222_i32 dim 1 : vector<2x256xf32>, i32 -> vector<2x256xf32>
    %577 = arith.andi %63, %126 : vector<2x256xi1>
    %c40 = arith.constant 40 : index
    %578 = memref.load %arg1[%c40] : memref<98xf32, #tpu.memory_space<smem>>
    %c89 = arith.constant 89 : index
    %579 = memref.load %arg1[%c89] : memref<98xf32, #tpu.memory_space<smem>>
    %580 = vector.broadcast %578 : f32 to vector<2x256xf32>
    %581 = vector.broadcast %579 : f32 to vector<2x256xf32>
    %582 = arith.select %9, %580, %581 : vector<2x256xi1>, vector<2x256xf32>
    %583 = arith.mulf %582, %576 : vector<2x256xf32>
    %cst_95 = arith.constant 0.000000e+00 : f32
    %584 = vector.broadcast %cst_95 : f32 to vector<2x256xf32>
    %585 = arith.select %577, %583, %584 : vector<2x256xi1>, vector<2x256xf32>
    %586 = arith.addf %575, %585 : vector<2x256xf32>
    %c221_i32 = arith.constant 221 : i32
    %587 = tpu.dynamic_rotate %3 by %c221_i32 dim 1 : vector<2x256xf32>, i32 -> vector<2x256xf32>
    %588 = arith.andi %63, %135 : vector<2x256xi1>
    %c41 = arith.constant 41 : index
    %589 = memref.load %arg1[%c41] : memref<98xf32, #tpu.memory_space<smem>>
    %c90 = arith.constant 90 : index
    %590 = memref.load %arg1[%c90] : memref<98xf32, #tpu.memory_space<smem>>
    %591 = vector.broadcast %589 : f32 to vector<2x256xf32>
    %592 = vector.broadcast %590 : f32 to vector<2x256xf32>
    %593 = arith.select %9, %591, %592 : vector<2x256xi1>, vector<2x256xf32>
    %594 = arith.mulf %593, %587 : vector<2x256xf32>
    %cst_96 = arith.constant 0.000000e+00 : f32
    %595 = vector.broadcast %cst_96 : f32 to vector<2x256xf32>
    %596 = arith.select %588, %594, %595 : vector<2x256xi1>, vector<2x256xf32>
    %597 = arith.addf %586, %596 : vector<2x256xf32>
    %c211_i32 = arith.constant 211 : i32
    %598 = tpu.dynamic_rotate %3 by %c211_i32 dim 1 : vector<2x256xf32>, i32 -> vector<2x256xf32>
    %599 = arith.andi %72, %81 : vector<2x256xi1>
    %c42 = arith.constant 42 : index
    %600 = memref.load %arg1[%c42] : memref<98xf32, #tpu.memory_space<smem>>
    %c91 = arith.constant 91 : index
    %601 = memref.load %arg1[%c91] : memref<98xf32, #tpu.memory_space<smem>>
    %602 = vector.broadcast %600 : f32 to vector<2x256xf32>
    %603 = vector.broadcast %601 : f32 to vector<2x256xf32>
    %604 = arith.select %9, %602, %603 : vector<2x256xi1>, vector<2x256xf32>
    %605 = arith.mulf %604, %598 : vector<2x256xf32>
    %cst_97 = arith.constant 0.000000e+00 : f32
    %606 = vector.broadcast %cst_97 : f32 to vector<2x256xf32>
    %607 = arith.select %599, %605, %606 : vector<2x256xi1>, vector<2x256xf32>
    %608 = arith.addf %597, %607 : vector<2x256xf32>
    %c210_i32 = arith.constant 210 : i32
    %609 = tpu.dynamic_rotate %3 by %c210_i32 dim 1 : vector<2x256xf32>, i32 -> vector<2x256xf32>
    %610 = arith.andi %72, %90 : vector<2x256xi1>
    %c43 = arith.constant 43 : index
    %611 = memref.load %arg1[%c43] : memref<98xf32, #tpu.memory_space<smem>>
    %c92 = arith.constant 92 : index
    %612 = memref.load %arg1[%c92] : memref<98xf32, #tpu.memory_space<smem>>
    %613 = vector.broadcast %611 : f32 to vector<2x256xf32>
    %614 = vector.broadcast %612 : f32 to vector<2x256xf32>
    %615 = arith.select %9, %613, %614 : vector<2x256xi1>, vector<2x256xf32>
    %616 = arith.mulf %615, %609 : vector<2x256xf32>
    %cst_98 = arith.constant 0.000000e+00 : f32
    %617 = vector.broadcast %cst_98 : f32 to vector<2x256xf32>
    %618 = arith.select %610, %616, %617 : vector<2x256xi1>, vector<2x256xf32>
    %619 = arith.addf %608, %618 : vector<2x256xf32>
    %c209_i32 = arith.constant 209 : i32
    %620 = tpu.dynamic_rotate %3 by %c209_i32 dim 1 : vector<2x256xf32>, i32 -> vector<2x256xf32>
    %621 = arith.andi %72, %99 : vector<2x256xi1>
    %c44 = arith.constant 44 : index
    %622 = memref.load %arg1[%c44] : memref<98xf32, #tpu.memory_space<smem>>
    %c93 = arith.constant 93 : index
    %623 = memref.load %arg1[%c93] : memref<98xf32, #tpu.memory_space<smem>>
    %624 = vector.broadcast %622 : f32 to vector<2x256xf32>
    %625 = vector.broadcast %623 : f32 to vector<2x256xf32>
    %626 = arith.select %9, %624, %625 : vector<2x256xi1>, vector<2x256xf32>
    %627 = arith.mulf %626, %620 : vector<2x256xf32>
    %cst_99 = arith.constant 0.000000e+00 : f32
    %628 = vector.broadcast %cst_99 : f32 to vector<2x256xf32>
    %629 = arith.select %621, %627, %628 : vector<2x256xi1>, vector<2x256xf32>
    %630 = arith.addf %619, %629 : vector<2x256xf32>
    %c208_i32 = arith.constant 208 : i32
    %631 = tpu.dynamic_rotate %3 by %c208_i32 dim 1 : vector<2x256xf32>, i32 -> vector<2x256xf32>
    %632 = arith.andi %72, %108 : vector<2x256xi1>
    %c45 = arith.constant 45 : index
    %633 = memref.load %arg1[%c45] : memref<98xf32, #tpu.memory_space<smem>>
    %c94 = arith.constant 94 : index
    %634 = memref.load %arg1[%c94] : memref<98xf32, #tpu.memory_space<smem>>
    %635 = vector.broadcast %633 : f32 to vector<2x256xf32>
    %636 = vector.broadcast %634 : f32 to vector<2x256xf32>
    %637 = arith.select %9, %635, %636 : vector<2x256xi1>, vector<2x256xf32>
    %638 = arith.mulf %637, %631 : vector<2x256xf32>
    %cst_100 = arith.constant 0.000000e+00 : f32
    %639 = vector.broadcast %cst_100 : f32 to vector<2x256xf32>
    %640 = arith.select %632, %638, %639 : vector<2x256xi1>, vector<2x256xf32>
    %641 = arith.addf %630, %640 : vector<2x256xf32>
    %c207_i32 = arith.constant 207 : i32
    %642 = tpu.dynamic_rotate %3 by %c207_i32 dim 1 : vector<2x256xf32>, i32 -> vector<2x256xf32>
    %643 = arith.andi %72, %117 : vector<2x256xi1>
    %c46 = arith.constant 46 : index
    %644 = memref.load %arg1[%c46] : memref<98xf32, #tpu.memory_space<smem>>
    %c95 = arith.constant 95 : index
    %645 = memref.load %arg1[%c95] : memref<98xf32, #tpu.memory_space<smem>>
    %646 = vector.broadcast %644 : f32 to vector<2x256xf32>
    %647 = vector.broadcast %645 : f32 to vector<2x256xf32>
    %648 = arith.select %9, %646, %647 : vector<2x256xi1>, vector<2x256xf32>
    %649 = arith.mulf %648, %642 : vector<2x256xf32>
    %cst_101 = arith.constant 0.000000e+00 : f32
    %650 = vector.broadcast %cst_101 : f32 to vector<2x256xf32>
    %651 = arith.select %643, %649, %650 : vector<2x256xi1>, vector<2x256xf32>
    %652 = arith.addf %641, %651 : vector<2x256xf32>
    %c206_i32 = arith.constant 206 : i32
    %653 = tpu.dynamic_rotate %3 by %c206_i32 dim 1 : vector<2x256xf32>, i32 -> vector<2x256xf32>
    %654 = arith.andi %72, %126 : vector<2x256xi1>
    %c47 = arith.constant 47 : index
    %655 = memref.load %arg1[%c47] : memref<98xf32, #tpu.memory_space<smem>>
    %c96 = arith.constant 96 : index
    %656 = memref.load %arg1[%c96] : memref<98xf32, #tpu.memory_space<smem>>
    %657 = vector.broadcast %655 : f32 to vector<2x256xf32>
    %658 = vector.broadcast %656 : f32 to vector<2x256xf32>
    %659 = arith.select %9, %657, %658 : vector<2x256xi1>, vector<2x256xf32>
    %660 = arith.mulf %659, %653 : vector<2x256xf32>
    %cst_102 = arith.constant 0.000000e+00 : f32
    %661 = vector.broadcast %cst_102 : f32 to vector<2x256xf32>
    %662 = arith.select %654, %660, %661 : vector<2x256xi1>, vector<2x256xf32>
    %663 = arith.addf %652, %662 : vector<2x256xf32>
    %c205_i32 = arith.constant 205 : i32
    %664 = tpu.dynamic_rotate %3 by %c205_i32 dim 1 : vector<2x256xf32>, i32 -> vector<2x256xf32>
    %665 = arith.andi %72, %135 : vector<2x256xi1>
    %c48 = arith.constant 48 : index
    %666 = memref.load %arg1[%c48] : memref<98xf32, #tpu.memory_space<smem>>
    %c97 = arith.constant 97 : index
    %667 = memref.load %arg1[%c97] : memref<98xf32, #tpu.memory_space<smem>>
    %668 = vector.broadcast %666 : f32 to vector<2x256xf32>
    %669 = vector.broadcast %667 : f32 to vector<2x256xf32>
    %670 = arith.select %9, %668, %669 : vector<2x256xi1>, vector<2x256xf32>
    %671 = arith.mulf %670, %664 : vector<2x256xf32>
    %cst_103 = arith.constant 0.000000e+00 : f32
    %672 = vector.broadcast %cst_103 : f32 to vector<2x256xf32>
    %673 = arith.select %665, %671, %672 : vector<2x256xi1>, vector<2x256xf32>
    %674 = arith.addf %663, %673 : vector<2x256xf32>
    %675 = vector.extract_strided_slice %674 {offsets = [0, 0], sizes = [1, 256], strides = [1, 1]} : vector<2x256xf32> to vector<1x256xf32>
    %676 = vector.extract_strided_slice %674 {offsets = [1, 0], sizes = [1, 256], strides = [1, 1]} : vector<2x256xf32> to vector<1x256xf32>
    %677 = arith.addf %675, %676 : vector<1x256xf32>
    %c0_104 = arith.constant 0 : index
    %678 = memref.load %arg2[%c0_104] : memref<1xf32, #tpu.memory_space<smem>>
    %679 = vector.broadcast %678 : f32 to vector<1x256xf32>
    %680 = arith.addf %677, %679 : vector<1x256xf32>
    %681 = arith.negf %680 : vector<1x256xf32>
    %682 = math.exp %681 : vector<1x256xf32>
    %cst_105 = arith.constant 1.000000e+00 : f32
    %683 = vector.broadcast %cst_105 : f32 to vector<1x256xf32>
    %684 = arith.addf %683, %682 : vector<1x256xf32>
    %685 = arith.divf %683, %684 : vector<1x256xf32>
    %686 = vector.shape_cast %685 : vector<1x256xf32> to vector<1x1x256xf32>
    %687 = vector.broadcast %686 : vector<1x1x256xf32> to vector<1x4x256xf32>
    %688 = arith.mulf %0, %687 : vector<1x4x256xf32>
    %c0_106 = arith.constant 0 : index
    %c0_107 = arith.constant 0 : index
    %c0_108 = arith.constant 0 : index
    %689 = vector.load %arg4[%c0_106, %c0_107, %c0_108] : memref<1x4x256xf32, #tpu.memory_space<vmem>>, vector<1x4x256xf32>
    tpu.vector_store %arg4[%c0_106, %c0_107, %c0_108], %688 {strides = array<i32>} : memref<1x4x256xf32, #tpu.memory_space<vmem>>, vector<1x4x256xf32>,
    return
  }
  func.func @transform_0(%arg0: i32) -> i32 {
    %c0_i32 = arith.constant 0 : i32
    %c0_i32_0 = arith.constant 0 : i32
    return %c0_i32 : i32
  }
  func.func @transform_1(%arg0: i32) -> i32 {
    %c0_i32 = arith.constant 0 : i32
    %c0_i32_0 = arith.constant 0 : i32
    return %c0_i32 : i32
  }
  func.func @transform_2(%arg0: i32) -> (i32, i32, i32) {
    %c0_i32 = arith.constant 0 : i32
    %c0_i32_0 = arith.constant 0 : i32
    %c0_i32_1 = arith.constant 0 : i32
    return %arg0, %c0_i32, %c0_i32_0 : i32, i32, i32
  }
  func.func @transform_3(%arg0: i32) -> (i32, i32, i32) {
    %c0_i32 = arith.constant 0 : i32
    %c0_i32_0 = arith.constant 0 : i32
    %c0_i32_1 = arith.constant 0 : i32
    return %arg0, %c0_i32, %c0_i32_0 : i32, i32, i32
  }
}

</mosaic_0001>

<bundles_post_ra>
// kernel: squeeze.2
= control target key start
LH: loop header
LB: loop body
LE: loop exit
PB: predicated region body
PF: predicated region fallthrough
CT: control target
= control target key end

     0   :  { %s59_s10 = smov 42   ;;  %s60_s11 = smov 28   ;;  %vm3_vm0 = vcmask 56320   ;;  %vm9_vm1 = vcmask 400720   ;;  %vm15_vm2 = vcmask 343320   ;;  %vm21_vm3 = vcmask 285920   ;;  %s99_s0 = inlined_call_operand.vmem [shape: f32[7,7], index: 0, kind: input, shape index: {}]   ;;  %s100_s1 = inlined_call_operand.vmem [shape: f32[49], index: 1, kind: output, shape index: {}]  }
   0x1   :  { %v47_v0 = vld [vmem:[%s99_s0 + $0x6] sm:$0x1]   ;;  %v49_v1 = vld [vmem:[%s99_s0 + $0x4] sm:$0x1]   ;;  %v48_v2 = vld [vmem:[%s99_s0 + $0x5] sm:$0x1]  }
   0x2   :  { %7 = vrot.lane.b32.xlu0 %v47_v0, %s59_s10  ;;  %19 = vrot.lane.b32.xlu1 %v49_v1, %s60_s11  ;;  %v50_v3 = vld [vmem:[%s99_s0 + $0x3] sm:$0x1]   ;;  %v2_v4 = vld [vmem:[%s99_s0] sm:$0x1]   ;;  %s61_s18 = smov 35   ;;  %s62_s19 = smov 21  }
   0x3   :  { %4 = vst.msk [vmem:[#allocation0] sm:$0x1] %vm3_vm0, %v2_v4   ;;  %v51_v5 = vld [vmem:[%s99_s0 + $0x2] sm:$0x1]   ;;  %v52_v6 = vld [vmem:[%s99_s0 + $0x1] sm:$0x1]  }
   0x4   :  { %s63_s0 = smov 14   ;;  %s64_s24 = smov 7   ;;  %vm27_vm4 = vcmask 228520   ;;  %vm33_vm5 = vcmask 171120   ;;  %vm39_vm6 = vcmask 113720  }
   0x6   :  { %13 = vrot.lane.b32.xlu0 %v48_v2, %s61_s18  ;;  %25 = vrot.lane.b32.xlu1 %v50_v3, %s62_s19 }
   0xa   :  { %31 = vrot.lane.b32.xlu0 %v51_v5, %s63_s0  ;;  %37 = vrot.lane.b32.xlu1 %v52_v6, %s64_s24 }
  0x74   :  { %v8_v7 = vpop.permute.xlu0 %7   ;;  %v20_v8 = vpop.permute.xlu1 %19  }
  0x75   :  { %10 = vst.msk [vmem:[#allocation0] sm:$0x1] %vm9_vm1, %v8_v7  }
  0x78   :  { %v14_v9 = vpop.permute.xlu0 %13   ;;  %v26_v10 = vpop.permute.xlu1 %25  }
  0x79   :  { %16 = vst.msk [vmem:[#allocation0] sm:$0x1] %vm15_vm2, %v14_v9  }
  0x7a   :  { %22 = vst.msk [vmem:[#allocation0] sm:$0x1] %vm21_vm3, %v20_v8  }
  0x7b   :  { %28 = vst.msk [vmem:[#allocation0] sm:$0x1] %vm27_vm4, %v26_v10  }
  0x7c   :  { %v32_v11 = vpop.permute.xlu0 %31   ;;  %v38_v12 = vpop.permute.xlu1 %37  }
  0x7d   :  { %34 = vst.msk [vmem:[#allocation0] sm:$0x1] %vm33_vm5, %v32_v11  }
  0x7e   :  { %40 = vst.msk [vmem:[#allocation0] sm:$0x1] %vm39_vm6, %v38_v12  }
  0x85   :  { %v44_v13 = vld [vmem:[#allocation0] sm:$0x1] }
  0x86   :  { %46 = vst [vmem:[%s100_s1] sm:$0x1] %v44_v13 }

// kernel: spatial_gate.1
= control target key start
LH: loop header
LB: loop body
LE: loop exit
PB: predicated region body
PF: predicated region fallthrough
CT: control target
= control target key end

     0   :  { %s3371_s0 = inlined_call_operand.vmem [shape: f32[98], index: 0, kind: input, shape index: {}]   ;;  %s3372_s1 = inlined_call_operand.<no memory space> [shape: f32[1], index: 1, kind: input, shape index: {}]   ;;  %s3373_s2 = inlined_call_operand.vmem [shape: f32[2,4,256], index: 2, kind: input, shape index: {}]   ;;  %s3374_s3 = inlined_call_operand.vmem [shape: f32[2,4,256], index: 3, kind: output, shape index: {}]  }
   0x1   :  { %3406 = sst [smem:[#allocation25_spill]] %s3371_s0 }
   0x2   :  { %8 = sst [smem:[#allocation2]] %s3372_s1 }
   0x3   :  { %9 = vsyncpa [#allocation4], 0  ;;  %s1706_s14 = smov 0  }
   0x4 LB: > { %s1416_s15 = sadd.s32 4294967295, %s1632_s14   ;;  %p1418_p0 = scmp.ge.s32.totalorder %s1632_s14, 1  ;;  %s1632_s14 = sphi %s1706_s14, %s15_s14  }
   0x5   : > { %p114_p1 = scmp.lt.s32.totalorder %s1632_s14, 3  ;;  %s3407_s0 = sld [smem:[#allocation25_spill]] }
   0x6   : > { %p1538_p3 = scmp.eq.s32.totalorder %s1416_s15, 0 }
   0x7   : > { %p1717_p2 = pnand %p1418_p0, %p114_p1 }
   0x9   : > { %p1534_p4 = pneg %p1717_p2 }
   0xb   : > { %s127_s18 = sshll.u32 %s3407_s0, 4  ;;  %p1535_p5 = pnand %p1538_p3, %p1534_p4  ;;  %s128_s18 = int_to_ptr.vmem [resolvable:$true] %s127_s18 }
   0xc   : > { %s1607_s19 = scalar_lea.vmem %s128_s18, 16  ;;  %p1615_p10 = scmp.lt.s32.totalorder %s128_s18, %s128_s18 }
   0xd   : > { %p1608_p6 = scmp.ne.s32.totalorder %s128_s18, %s1607_s19  ;;  %p1609_p7 = pneg %p1535_p5 }
   0xe   : > { %p1616_p11 = scmp.lt.s32.totalorder %s1607_s19, %s1607_s19 }
   0xf   : > { %p1610_p8 = pnand %p1609_p7, %p1608_p6 }
  0x10   : > { %p1617_p12 = por %p1616_p11, %p1615_p10 }
  0x11   : > { %p1611_p9 = pneg %p1610_p8 }
  0x13   : > { %p1618_p13 = pnand %p1617_p12, %p1611_p9 }
  0x15   : > { %1621 = shalt.err (!%p1618_p13)
}
  0x16   : > { %s1634_s20 = smov [#allocation3]   ;;  %151 = sbr.rel (%p1717_p2) target bundleno = 411 (0x19b), region = 32 }
  0x17   : > { %1537 = dma.vmem_to_smem (!%p1535_p5), %s128_s18, 16, %s1634_s20, [#allocation4]  }
  0x1d   : > { %1627 = dma.done.wait (%p1538_p3), [#allocation4], 16  }
  0x1e   : > { %1629 = vsyncadd (%p1538_p3), [#allocation4], 4294967280 }
  0x1f   : > { %157 = sfence }
  0x20   : > { %p176_p0 = scmp.lt.s32.totalorder %s1416_s15, 1  ;;  %vm190_vm0 = vcmask 1043456   ;;  %vm219_vm1 = vcmask 1040384   ;;  %s1635_s25 = smov 50   ;;  %v222_v32 = vlaneseq }
  0x21   : > { %s1636_s26 = smov 51   ;;  %s1637_s27 = smov 49  }
  0x22   : > { %s3582_s15 = smov (!%p176_p0, %s1416_s15), 1  ;;  %s1638_s28 = smov 48   ;;  %v1799_v33 = vand.u32 127, %v222_v32  ;;  %v1826_v38 = vshrl.u32 %v222_v32, 7 }
  0x23   : > { %s3378_s21 = sshll.u32 %s3582_s15, 3  ;;  %s1639_s29 = smov 47  }
  0x24   : > { %s1736_s24 = scalar_lea.vmem %s3373_s2, %s3378_s21  ;;  %s1640_s30 = smov 46   ;;  %v1808_v36 = vadd.s32 128, %v1799_v33  ;;  %v1813_v37 = vand.u32 15, %v1799_v33  ;;  %vm362_vm2 = vcmp.lt.s32.totalorder %v1799_v33, 50  ;;  %v1836_v42 = vadd.s32 4294967248, %v1799_v33 }
  0x25   : > { %v186_v0 = vld [vmem:[%s1736_s24] sm:$0xff]  ;;  %s1641_s4 = smov 45   ;;  %s1642_s5 = smov 35   ;;  %vm382_vm3 = vcmp.lt.s32.totalorder %v1799_v33, 49  ;;  %vm3405_vm4 = vcmp.lt.s32.totalorder %v1826_v38, 1  ;;  %vm402_vm7 = vcmp.lt.s32.totalorder %v1799_v33, 48 }
  0x26   : > { %v191_v1 = vsel %vm190_vm0, %v186_v0, -inf  ;;  %v205_v2 = vsel %vm190_vm0, %v186_v0, 0.0  ;;  %v188_v3 = vcombine.high %v186_v0, %v186_v0  ;;  %s1643_s6 = smov 34   ;;  %s1644_s7 = smov 33   ;;  %v1833_v40 = vand.u32 15, %v1808_v36 }
  0x27   : > { %v192_v4 = vrot.slane %v191_v1, 4  ;;  %v206_v5 = vrot.slane %v205_v2, 4  ;;  %s1645_s8 = smov 32   ;;  %s1646_s9 = smov 31   ;;  %v1839_v43 = vadd.s32 4294967294, %v1813_v37  ;;  %v1863_v50 = vadd.s32 4294967295, %v1813_v37 }
  0x28   : > { %v198_v6 = vsel %vm190_vm0, %v188_v3, -inf  ;;  %v212_v7 = vsel %vm190_vm0, %v188_v3, 0.0  ;;  %s1647_s10 = smov 30   ;;  %s1648_s11 = smov 29   ;;  %v1858_v46 = vadd.s32 4294967294, %v1833_v40  ;;  %vm232_vm5 = vcmp.ge.s32.totalorder %v1836_v42, 0 }
  0x29   : > { %v193_v8 = vmax.f32 %v191_v1, %v192_v4  ;;  %v207_v9 = vadd.f32 %v206_v5, %v205_v2  ;;  %v199_v10 = vrot.slane %v198_v6, 4  ;;  %v213_v11 = vrot.slane %v212_v7, 4  ;;  %s1649_s12 = smov 19   ;;  %s1650_s13 = smov 18  }
  0x2a   : > { %s1651_s16 = smov 17   ;;  %s1652_s17 = smov 16   ;;  %vm3375_vm6 = vcmp.ge.s32.totalorder %v1839_v43, 0  ;;  %v1886_v56 = vadd.s32 4294967295, %v1833_v40  ;;  %v1893_v58 = vadd.s32 1, %v1813_v37  ;;  %v1899_v62 = vadd.s32 4294967293, %v1813_v37 }
  0x2b   : > { %v194_v12 = vrot.slane %v193_v8, 2  ;;  %v208_v13 = vrot.slane %v207_v9, 2  ;;  %v200_v14 = vmax.f32 %v198_v6, %v199_v10  ;;  %v214_v15 = vadd.f32 %v213_v11, %v212_v7  ;;  %s1653_s18 = smov 15   ;;  %s1654_s1 = smov 14  }
  0x2c   : > { %s1655_s19 = smov 13   ;;  %s1656_s20 = smov 3   ;;  %vm302_vm8 = vcmp.ge.s32.totalorder %v1863_v50, 0  ;;  %v1909_v3 = vadd.s32 1, %v1833_v40  ;;  %vm422_vm9 = vcmp.lt.s32.totalorder %v1799_v33, 47  ;;  %vm295_vm10 = vcmp.ge.s32.totalorder %v1858_v46, 0 }
  0x2d   : > { %v195_v16 = vmax.f32 %v193_v8, %v194_v12  ;;  %v209_v17 = vadd.f32 %v208_v13, %v207_v9  ;;  %v201_v18 = vrot.slane %v200_v14, 2  ;;  %v215_v19 = vrot.slane %v214_v15, 2  ;;  %s1657_s22 = smov 2   ;;  %s1658_s23 = smov 1  }
  0x2e   : > { %v1922_v6 = vadd.s32 2, %v1813_v37  ;;  %v1925_v7 = vadd.s32 2, %v1833_v40  ;;  %vm442_vm11 = vcmp.lt.s32.totalorder %v1799_v33, 46  ;;  %v1939_v10 = vadd.s32 4294967293, %v1833_v40  ;;  %s2382_s21 = sld [smem:[#allocation3 + $0x1b]]  ;;  %s2384_s0 = sld [smem:[#allocation3 + $0x4c]] }
  0x2f   : > { %v196_v20 = vrot.slane %v195_v16, 1  ;;  %v210_v21 = vrot.slane %v209_v17, 1  ;;  %v202_v22 = vmax.f32 %v200_v14, %v201_v18  ;;  %v216_v23 = vadd.f32 %v215_v19, %v214_v15 }
  0x30   : > { %3409 = vst [vmem:[#allocation6_spill] sm:$0xff] %v1939_v10  ;;  %vm303_vm12 = vcmp.ge.s32.totalorder %v1886_v56, 0  ;;  %vm3376_vm13 = vcmp.ge.s32.totalorder %v1899_v62, 0  ;;  %vm3396_vm14 = vcmp.lt.s32.totalorder %v1893_v58, 16  ;;  %vm3377_vm15 = vcmp.lt.s32.totalorder %v1922_v6, 16 }
  0x31   : > { %v197_v24 = vmax.f32 %v195_v16, %v196_v20  ;;  %v211_v25 = vadd.f32 %v210_v21, %v209_v17  ;;  %v203_v26 = vrot.slane %v202_v22, 1  ;;  %v217_v27 = vrot.slane %v216_v23, 1 }
  0x32   : > { %v1953_v17 = vadd.s32 3, %v1813_v37  ;;  %vm3383_vm0 = vcmp.ge.s32.totalorder %v1939_v10, 0 }
  0x33   : > { %v1739_v28 = vsel %vm219_vm1, %v197_v24, %v211_v25  ;;  %v204_v29 = vmax.f32 %v202_v22, %v203_v26  ;;  %v218_v30 = vadd.f32 %v217_v27, %v216_v23  ;;  %v1973_v25 = vadd.s32 4294967264, %v1799_v33 }
  0x34   : > { %358 = vrot.lane.b32.xlu1 %v1739_v28, %s1635_s25  ;;  %338 = vrot.lane.b32.xlu0 %v1739_v28, %s1636_s26 }
  0x35   : > { %v1743_v31 = vsel %vm219_vm1, %v204_v29, %v218_v30  ;;  %vm342_vm1 = vcmp.lt.s32.totalorder %v1799_v33, 51  ;;  %v1980_v29 = vadd.s32 3, %v1833_v40 }
  0x38   : > { %378 = vrot.lane.b32.xlu0 %v1739_v28, %s1637_s27  ;;  %360 = vrot.lane.b32.xlu1 %v1743_v31, %s1635_s25  ;;  %s1659_s25 = smov 127  }
  0x3c   : > { %398 = vrot.lane.b32.xlu0 %v1739_v28, %s1638_s28  ;;  %380 = vrot.lane.b32.xlu1 %v1743_v31, %s1637_s27  ;;  %s1661_s27 = smov 125  }
  0x40   : > { %418 = vrot.lane.b32.xlu0 %v1739_v28, %s1639_s29  ;;  %400 = vrot.lane.b32.xlu1 %v1743_v31, %s1638_s28  ;;  %s1662_s28 = smov 115  }
  0x44   : > { %438 = vrot.lane.b32.xlu0 %v1739_v28, %s1640_s30  ;;  %420 = vrot.lane.b32.xlu1 %v1743_v31, %s1639_s29  ;;  %s1663_s29 = smov 114  }
  0x48   : > { %440 = vrot.lane.b32.xlu1 %v1743_v31, %s1640_s30  ;;  %340 = vrot.lane.b32.xlu0 %v1743_v31, %s1636_s26  ;;  %s1660_s26 = smov 126   ;;  %s1803_s30 = sld [smem:[#allocation3 + $0x1]] }
  0x4c   : > { %460 = vrot.lane.b32.xlu1 %v1743_v31, %s1641_s4  ;;  %458 = vrot.lane.b32.xlu0 %v1739_v28, %s1641_s4  ;;  %s1810_s4 = sld [smem:[#allocation3 + $0x32]] }
  0x4e   : > { %v369_v47 = vstv %s1803_s30  ;;  %s2042_s30 = sld [smem:[#allocation3 + $0x9]] }
  0x50   : > { %480 = vrot.lane.b32.xlu1 %v1743_v31, %s1642_s5  ;;  %478 = vrot.lane.b32.xlu0 %v1739_v28, %s1642_s5  ;;  %s1815_s5 = sld [smem:[#allocation3 + $0x2]] }
  0x52   : > { %v370_v48 = vstv %s1810_s4  ;;  %s2044_s4 = sld [smem:[#allocation3 + $0x3a]] }
  0x53   : > { %v371_v63 = vsel %vm3405_vm4, %v369_v47, %v370_v48 }
  0x54   : > { %500 = vrot.lane.b32.xlu1 %v1743_v31, %s1643_s6  ;;  %498 = vrot.lane.b32.xlu0 %v1739_v28, %s1643_s6  ;;  %s1817_s6 = sld [smem:[#allocation3 + $0x33]] }
  0x56   : > { %v389_v52 = vstv %s1815_s5  ;;  %s1670_s5 = smov 98  }
  0x58   : > { %520 = vrot.lane.b32.xlu1 %v1743_v31, %s1644_s7  ;;  %518 = vrot.lane.b32.xlu0 %v1739_v28, %s1644_s7  ;;  %s1664_s7 = smov 113  }
  0x5a   : > { %v390_v53 = vstv %s1817_s6  ;;  %s2083_s6 = sld [smem:[#allocation3 + $0xa]] }
  0x5b   : > { %v1906_v0 = vsel %vm3405_vm4, %v389_v52, %v390_v53 }
  0x5c   : > { %540 = vrot.lane.b32.xlu1 %v1743_v31, %s1645_s8  ;;  %538 = vrot.lane.b32.xlu0 %v1739_v28, %s1645_s8  ;;  %s1822_s8 = sld [smem:[#allocation3 + $0x3]] }
  0x60   : > { %560 = vrot.lane.b32.xlu1 %v1743_v31, %s1646_s9  ;;  %558 = vrot.lane.b32.xlu0 %v1739_v28, %s1646_s9  ;;  %s1824_s9 = sld [smem:[#allocation3 + $0x34]] }
  0x62   : > { %v409_v57 = vstv %s1822_s8  ;;  %s1671_s8 = smov 97  }
  0x64   : > { %580 = vrot.lane.b32.xlu1 %v1743_v31, %s1647_s10  ;;  %578 = vrot.lane.b32.xlu0 %v1739_v28, %s1647_s10  ;;  %s1828_s10 = sld [smem:[#allocation3 + $0x4]] }
  0x66   : > { %v410_v59 = vstv %s1824_s9  ;;  %s2123_s9 = sld [smem:[#allocation3 + $0xb]] }
  0x67   : > { %v1929_v8 = vsel %vm3405_vm4, %v409_v57, %v410_v59 }
  0x68   : > { %600 = vrot.lane.b32.xlu1 %v1743_v31, %s1648_s11  ;;  %598 = vrot.lane.b32.xlu0 %v1739_v28, %s1648_s11  ;;  %s1830_s11 = sld [smem:[#allocation3 + $0x35]] }
  0x6a   : > { %v429_v60 = vstv %s1828_s10  ;;  %s2125_s10 = sld [smem:[#allocation3 + $0x3c]] }
  0x6c   : > { %620 = vrot.lane.b32.xlu1 %v1743_v31, %s1649_s12  ;;  %618 = vrot.lane.b32.xlu0 %v1739_v28, %s1649_s12  ;;  %s1665_s12 = smov 112  }
  0x6e   : > { %v430_v61 = vstv %s1830_s11  ;;  %s1672_s11 = smov 96  }
  0x6f   : > { %v1935_v9 = vsel %vm3405_vm4, %v429_v60, %v430_v61 }
  0x70   : > { %640 = vrot.lane.b32.xlu1 %v1743_v31, %s1650_s13  ;;  %638 = vrot.lane.b32.xlu0 %v1739_v28, %s1650_s13  ;;  %s1848_s13 = sld [smem:[#allocation3 + $0x5]] }
  0x74   : > { %660 = vrot.lane.b32.xlu1 %v1743_v31, %s1651_s16  ;;  %658 = vrot.lane.b32.xlu0 %v1739_v28, %s1651_s16  ;;  %s1850_s16 = sld [smem:[#allocation3 + $0x36]] }
  0x76   : > { %v449_v11 = vstv %s1848_s13  ;;  %s2164_s13 = sld [smem:[#allocation3 + $0x3d]] }
  0x78   : > { %680 = vrot.lane.b32.xlu1 %v1743_v31, %s1652_s17  ;;  %678 = vrot.lane.b32.xlu0 %v1739_v28, %s1652_s17  ;;  %s1853_s17 = sld [smem:[#allocation3]] }
  0x7a   : > { %v450_v12 = vstv %s1850_s16  ;;  %s1673_s16 = smov 95  }
  0x7b   : > { %v1968_v24 = vsel %vm3405_vm4, %v449_v11, %v450_v12 }
  0x7c   : > { %700 = vrot.lane.b32.xlu1 %v1743_v31, %s1653_s18  ;;  %698 = vrot.lane.b32.xlu0 %v1739_v28, %s1653_s18  ;;  %s1855_s18 = sld [smem:[#allocation3 + $0x31]] }
  0x7e   : > { %v349_v13 = vstv %s1853_s17  ;;  %s2192_s17 = sld [smem:[#allocation3 + $0xd]] }
  0x80   : > { %720 = vrot.lane.b32.xlu1 %v1743_v31, %s1654_s1  ;;  %718 = vrot.lane.b32.xlu0 %v1739_v28, %s1654_s1  ;;  %s1865_s1 = sld [smem:[#allocation3 + $0x6]] }
  0x82   : > { %v350_v16 = vstv %s1855_s18  ;;  %s2194_s18 = sld [smem:[#allocation3 + $0x3e]] }
  0x83   : > { %v351_v27 = vsel %vm3405_vm4, %v349_v13, %v350_v16 }
  0x84   : > { %740 = vrot.lane.b32.xlu1 %v1743_v31, %s1655_s19  ;;  %738 = vrot.lane.b32.xlu0 %v1739_v28, %s1655_s19  ;;  %s1867_s19 = sld [smem:[#allocation3 + $0x37]] }
  0x86   : > { %v469_v18 = vstv %s1865_s1  ;;  %s1674_s1 = smov 94  }
  0x88   : > { %760 = vrot.lane.b32.xlu1 %v1743_v31, %s1656_s20  ;;  %758 = vrot.lane.b32.xlu0 %v1739_v28, %s1656_s20  ;;  %s1881_s20 = sld [smem:[#allocation3 + $0x7]] }
  0x8a   : > { %v470_v19 = vstv %s1867_s19  ;;  %s2209_s19 = sld [smem:[#allocation3 + $0xe]] }
  0x8c   : > { %780 = vrot.lane.b32.xlu1 %v1743_v31, %s1657_s22  ;;  %778 = vrot.lane.b32.xlu0 %v1739_v28, %s1657_s22  ;;  %s1883_s22 = sld [smem:[#allocation3 + $0x38]] }
  0x8e   : > { %v489_v22 = vstv %s1881_s20  ;;  %s2211_s20 = sld [smem:[#allocation3 + $0x3f]] }
  0x90   : > { %800 = vrot.lane.b32.xlu1 %v1743_v31, %s1658_s23  ;;  %798 = vrot.lane.b32.xlu0 %v1739_v28, %s1658_s23  ;;  %s1666_s23 = smov 111  }
  0x92   : > { %v490_v23 = vstv %s1883_s22  ;;  %s1675_s22 = smov 93  }
  0x93   : > { %v2000_v40 = vsel %vm3405_vm4, %v489_v22, %v490_v23 }
  0x94   : > { %833 = vrot.lane.b32.xlu1 %v1743_v31, %s1659_s25  ;;  %831 = vrot.lane.b32.xlu0 %v1739_v28, %s1659_s25  ;;  %s1667_s25 = smov 110  }
  0x98   : > { %853 = vrot.lane.b32.xlu1 %v1743_v31, %s1660_s26  ;;  %851 = vrot.lane.b32.xlu0 %v1739_v28, %s1660_s26  ;;  %s1946_s26 = sld [smem:[#allocation3 + $0x8]] }
  0x9c   : > { %873 = vrot.lane.b32.xlu1 %v1743_v31, %s1661_s27  ;;  %871 = vrot.lane.b32.xlu0 %v1739_v28, %s1661_s27  ;;  %s1948_s27 = sld [smem:[#allocation3 + $0x39]] }
  0xa0   : > { %893 = vrot.lane.b32.xlu1 %v1743_v31, %s1662_s28  ;;  %891 = vrot.lane.b32.xlu0 %v1739_v28, %s1662_s28  ;;  %s1668_s28 = smov 109  }
  0xa4   : > { %913 = vrot.lane.b32.xlu1 %v1743_v31, %s1663_s29  ;;  %911 = vrot.lane.b32.xlu0 %v1739_v28, %s1663_s29  ;;  %s1669_s29 = smov 99  }
  0xa6   : > { %v359_v34 = vpop.permute.xlu1 %358  ;;  %v1805_v35 = vpop.permute.xlu0 %338 }
  0xa8   : > { %933 = vrot.lane.b32.xlu1 %v1743_v31, %s1664_s7  ;;  %931 = vrot.lane.b32.xlu0 %v1739_v28, %s1664_s7  ;;  %s2085_s7 = sld [smem:[#allocation3 + $0x3b]] }
  0xaa   : > { %v379_v39 = vpop.permute.xlu0 %378  ;;  %v361_v41 = vpop.permute.xlu1 %360 }
  0xab   : > { %v1841_v44 = vsel %vm362_vm2, %v359_v34, %v361_v41  ;;  %v1843_v45 = vsel %vm362_vm2, %v361_v41, %v359_v34  ;;  %vm482_vm2 = vcmp.lt.s32.totalorder %v1799_v33, 35 }
  0xac   : > { %953 = vrot.lane.b32.xlu1 %v1743_v31, %s1665_s12  ;;  %951 = vrot.lane.b32.xlu0 %v1739_v28, %s1665_s12  ;;  %v372_v26 = vmul.f32 %v371_v63, %v1843_v45  ;;  %v373_v32 = vmul.f32 %v371_v63, %v1841_v44  ;;  %s2162_s12 = sld [smem:[#allocation3 + $0xc]] }
  0xae   : > { %v399_v49 = vpop.permute.xlu0 %398  ;;  %v381_v51 = vpop.permute.xlu1 %380  ;;  %v375_v59 = vsel %vm295_vm10, %v373_v32, 0.0 }
  0xaf   : > { %v1875_v54 = vsel %vm382_vm3, %v379_v39, %v381_v51  ;;  %v1879_v55 = vsel %vm382_vm3, %v381_v51, %v379_v39  ;;  %vm462_vm3 = vcmp.lt.s32.totalorder %v1799_v33, 45  ;;  %v1995_v39 = vsel %vm3405_vm4, %v469_v18, %v470_v19 }
  0xb0   : > { %973 = vrot.lane.b32.xlu1 %v1743_v31, %s1666_s23  ;;  %971 = vrot.lane.b32.xlu0 %v1739_v28, %s1666_s23  ;;  %v393_v51 = vmul.f32 %v1906_v0, %v1875_v54  ;;  %v509_v54 = vstv %s1946_s26  ;;  %v549_v19 = vstv %s2083_s6  ;;  %s1676_s23 = smov 83   ;;  %s1678_s26 = smov 81  }
  0xb1   : > { %s2318_s6 = sld [smem:[#allocation3 + $0x10]] }
  0xb2   : > { %v419_v1 = vpop.permute.xlu0 %418  ;;  %v401_v2 = vpop.permute.xlu1 %400 }
  0xb3   : > { %v1915_v4 = vsel %vm402_vm7, %v399_v49, %v401_v2  ;;  %v1919_v5 = vsel %vm402_vm7, %v401_v2, %v399_v49  ;;  %vm1987_vm7 = vmand %vm232_vm5, %vm3375_vm6  ;;  %v392_v49 = vmul.f32 %v1906_v0, %v1879_v55  ;;  %vm502_vm6 = vcmp.lt.s32.totalorder %v1799_v33, 34 }
  0xb4   : > { %993 = vrot.lane.b32.xlu1 %v1743_v31, %s1667_s25  ;;  %991 = vrot.lane.b32.xlu0 %v1739_v28, %s1667_s25  ;;  %v374_v57 = vsel %vm1987_vm7, %v372_v26, 0.0  ;;  %v510_v55 = vstv %s1948_s27  ;;  %v412_v60 = vmul.f32 %v1929_v8, %v1919_v5  ;;  %v395_v5 = vsel %vm303_vm12, %v393_v51, 0.0  ;;  %s1677_s25 = smov 82   ;;  %s1679_s27 = smov 80  }
  0xb5   : > { %v413_v18 = vmul.f32 %v1929_v8, %v1915_v4  ;;  %vm522_vm7 = vcmp.lt.s32.totalorder %v1799_v33, 33  ;;  %v529_v51 = vstv %s2042_s30  ;;  %s1682_s30 = smov 77  }
  0xb6   : > { %v439_v14 = vpop.permute.xlu0 %438  ;;  %v421_v15 = vpop.permute.xlu1 %420 }
  0xb7   : > { %v423_v20 = vsel %vm422_vm9, %v419_v1, %v421_v15  ;;  %v424_v21 = vsel %vm422_vm9, %v421_v15, %v419_v1  ;;  %vm2011_vm9 = vmand %vm232_vm5, %vm3376_vm13  ;;  %vm335_vm13 = vcmp.lt.s32.totalorder %v1980_v29, 16 }
  0xb8   : > { %1013 = vrot.lane.b32.xlu1 %v1743_v31, %s1668_s28  ;;  %1011 = vrot.lane.b32.xlu0 %v1739_v28, %s1668_s28  ;;  %v432_v15 = vmul.f32 %v1935_v9, %v424_v21  ;;  %v433_v16 = vmul.f32 %v1935_v9, %v423_v20  ;;  %v511_v9 = vsel %vm3405_vm4, %v509_v54, %v510_v55  ;;  %v414_v20 = vsel %vm232_vm5, %v412_v60, 0.0  ;;  %s1680_s28 = smov 79  }
  0xb9   : > { %v589_v60 = vstv %s2162_s12  ;;  %s2334_s12 = sld [smem:[#allocation3 + $0x13]] }
  0xba   : > { %v441_v34 = vpop.permute.xlu1 %440  ;;  %v341_v37 = vpop.permute.xlu0 %340 }
  0xbb   : > { %v443_v41 = vsel %vm442_vm11, %v439_v14, %v441_v34  ;;  %v444_v44 = vsel %vm442_vm11, %v441_v34, %v439_v14  ;;  %v343_v47 = vsel %vm342_vm1, %v1805_v35, %v341_v37  ;;  %v344_v48 = vsel %vm342_vm1, %v341_v37, %v1805_v35  ;;  %vm2033_vm1 = vmand %vm232_vm5, %vm302_vm8 }
  0xbc   : > { %v352_v52 = vmul.f32 %v351_v27, %v344_v48  ;;  %v353_v53 = vmul.f32 %v351_v27, %v343_v47  ;;  %1033 = vrot.lane.b32.xlu1 %v1743_v31, %s1669_s29  ;;  %vm240_vm11 = vcmp.ge.s32.totalorder %v1973_v25, 0  ;;  %1031 = vrot.lane.b32.xlu0 %v1739_v28, %s1669_s29  ;;  %v394_v14 = vsel %vm2033_vm1, %v392_v49, 0.0  ;;  %s1681_s29 = smov 78  }
  0xbd   : > { %v452_v4 = vmul.f32 %v1968_v24, %v444_v44  ;;  %v453_v8 = vmul.f32 %v1968_v24, %v443_v41  ;;  %vm3420_vm1 = vcmp.lt.s32.totalorder %v1909_v3, 16 }
  0xbe   : > { %v354_v61 = vsel %vm2011_vm9, %v352_v52, 0.0  ;;  %v355_v63 = vsel %vm3383_vm0, %v353_v53, 0.0  ;;  %v461_v0 = vpop.permute.xlu1 %460  ;;  %v459_v1 = vpop.permute.xlu0 %458  ;;  %vm2091_vm9 = vmand %vm232_vm5, %vm3377_vm15  ;;  %v435_v41 = vsel %vm3420_vm1, %v433_v16, 0.0  ;;  %vm3421_vm15 = vcmp.lt.s32.totalorder %v1953_v17, 16 }
  0xbf   : > { %v376_v2 = vadd.f32 %v374_v57, %v354_v61  ;;  %v377_v11 = vadd.f32 %v375_v59, %v355_v63  ;;  %v463_v12 = vsel %vm462_vm3, %v459_v1, %v461_v0  ;;  %v464_v13 = vsel %vm462_vm3, %v461_v0, %v459_v1  ;;  %vm2071_vm3 = vmand %vm232_vm5, %vm3396_vm14 }
  0xc0   : > { %1053 = vrot.lane.b32.xlu1 %v1743_v31, %s1670_s5  ;;  %1051 = vrot.lane.b32.xlu0 %v1739_v28, %s1670_s5  ;;  %v434_v37 = vsel %vm2071_vm3, %v432_v15, 0.0  ;;  %v472_v44 = vmul.f32 %v1995_v39, %v464_v13  ;;  %v473_v45 = vmul.f32 %v1995_v39, %v463_v12  ;;  %v530_v52 = vstv %s2044_s4  ;;  %s2314_s4 = sld [smem:[#allocation3 + $0xf]]  ;;  %s2316_s5 = sld [smem:[#allocation3 + $0x40]] }
  0xc1   : > { %v396_v22 = vadd.f32 %v394_v14, %v376_v2  ;;  %v397_v23 = vadd.f32 %v395_v5, %v377_v11  ;;  %v454_v39 = vsel %vm2091_vm9, %v452_v4, 0.0  ;;  %vm3424_vm3 = vcmp.lt.s32.totalorder %v1925_v7, 16 }
  0xc2   : > { %v481_v21 = vpop.permute.xlu1 %480  ;;  %v479_v26 = vpop.permute.xlu0 %478  ;;  %v455_v53 = vsel %vm3424_vm3, %v453_v8, 0.0  ;;  %v475_v0 = vsel %vm335_vm13, %v473_v45, 0.0  ;;  %vm3428_vm9 = vcmp.ge.s32.totalorder %v1839_v43, 0  ;;  %v531_v14 = vsel %vm3405_vm4, %v529_v51, %v530_v52  ;;  %vm2217_vm3 = vmand %vm240_vm11, %vm3396_vm14 }
  0xc3   : > { %v416_v30 = vadd.f32 %v414_v20, %v396_v22  ;;  %v417_v24 = vadd.f32 %v413_v18, %v397_v23  ;;  %v483_v32 = vsel %vm482_vm2, %v479_v26, %v481_v21  ;;  %v484_v34 = vsel %vm482_vm2, %v481_v21, %v479_v26  ;;  %vm2110_vm2 = vmand %vm232_vm5, %vm3421_vm15 }
  0xc4   : > { %1073 = vrot.lane.b32.xlu1 %v1743_v31, %s1671_s8  ;;  %1071 = vrot.lane.b32.xlu0 %v1739_v28, %s1671_s8  ;;  %v492_v57 = vmul.f32 %v2000_v40, %v484_v34  ;;  %v493_v35 = vmul.f32 %v2000_v40, %v483_v32  ;;  %vm3425_vm5 = vcmp.ge.s32.totalorder %v1899_v62, 0  ;;  %v474_v63 = vsel %vm2110_vm2, %v472_v44, 0.0  ;;  %vm2170_vm2 = vmand %vm240_vm11, %vm302_vm8  ;;  %s2322_s8 = sld [smem:[#allocation3 + $0x11]] }
  0xc5   : > { %v436_v47 = vadd.f32 %v434_v37, %v416_v30  ;;  %v437_v48 = vadd.f32 %v435_v41, %v417_v24  ;;  %vm2131_vm15 = vmand %vm240_vm11, %vm3425_vm5  ;;  %vm542_vm1 = vcmp.lt.s32.totalorder %v1799_v33, 32  ;;  %v550_v22 = vstv %s2085_s7  ;;  %s2320_s7 = sld [smem:[#allocation3 + $0x41]] }
  0xc6   : > { %v501_v54 = vpop.permute.xlu1 %500  ;;  %v499_v42 = vpop.permute.xlu0 %498  ;;  %v494_v5 = vsel %vm2131_vm15, %v492_v57, 0.0  ;;  %v495_v15 = vsel %vm3383_vm0, %v493_v35, 0.0  ;;  %v551_v34 = vsel %vm3405_vm4, %v549_v19, %v550_v22  ;;  %vm582_vm5 = vcmp.lt.s32.totalorder %v1799_v33, 30 }
  0xc7   : > { %v456_v55 = vadd.f32 %v454_v39, %v436_v47  ;;  %v457_v59 = vadd.f32 %v455_v53, %v437_v48  ;;  %v503_v61 = vsel %vm502_vm6, %v499_v42, %v501_v54  ;;  %v504_v40 = vsel %vm502_vm6, %v501_v54, %v499_v42  ;;  %vm2148_vm6 = vmand %vm240_vm11, %vm3428_vm9 }
  0xc8   : > { %v512_v1 = vmul.f32 %v511_v9, %v504_v40  ;;  %v513_v2 = vmul.f32 %v511_v9, %v503_v61  ;;  %1093 = vrot.lane.b32.xlu1 %v1743_v31, %s1672_s11  ;;  %1091 = vrot.lane.b32.xlu0 %v1739_v28, %s1672_s11  ;;  %v569_v47 = vstv %s2123_s9  ;;  %v570_v48 = vstv %s2125_s10  ;;  %s2324_s9 = sld [smem:[#allocation3 + $0x42]]  ;;  %s2332_s11 = sld [smem:[#allocation3 + $0x43]] }
  0xc9   : > { %v476_v11 = vadd.f32 %v474_v63, %v456_v55  ;;  %v477_v12 = vadd.f32 %v475_v0, %v457_v59  ;;  %v571_v35 = vsel %vm3405_vm4, %v569_v47, %v570_v48  ;;  %v590_v61 = vstv %s2164_s13  ;;  %s2330_s10 = sld [smem:[#allocation3 + $0x12]]  ;;  %s2336_s13 = sld [smem:[#allocation3 + $0x44]] }
  0xca   : > { %v521_v16 = vpop.permute.xlu1 %520  ;;  %v519_v18 = vpop.permute.xlu0 %518  ;;  %v514_v21 = vsel %vm2148_vm6, %v512_v1, 0.0  ;;  %v515_v26 = vsel %vm295_vm10, %v513_v2, 0.0  ;;  %vm3435_vm15 = vcmp.lt.s32.totalorder %v1909_v3, 16  ;;  %vm3436_vm9 = vcmp.lt.s32.totalorder %v1922_v6, 16 }
  0xcb   : > { %v496_v23 = vadd.f32 %v494_v5, %v476_v11  ;;  %v497_v9 = vadd.f32 %v495_v15, %v477_v12  ;;  %v523_v4 = vsel %vm522_vm7, %v519_v18, %v521_v16  ;;  %v524_v8 = vsel %vm522_vm7, %v521_v16, %v519_v18  ;;  %vm2236_vm6 = vmand %vm240_vm11, %vm3436_vm9 }
  0xcc   : > { %v532_v27 = vmul.f32 %v531_v14, %v524_v8  ;;  %v533_v30 = vmul.f32 %v531_v14, %v523_v4  ;;  %1113 = vrot.lane.b32.xlu1 %v1743_v31, %s1673_s16  ;;  %1111 = vrot.lane.b32.xlu0 %v1739_v28, %s1673_s16  ;;  %vm562_vm7 = vcmp.lt.s32.totalorder %v1799_v33, 31  ;;  %v591_v12 = vsel %vm3405_vm4, %v589_v60, %v590_v61  ;;  %s2338_s16 = sld [smem:[#allocation3 + $0x14]] }
  0xcd   : > { %v516_v24 = vadd.f32 %v514_v21, %v496_v23  ;;  %v517_v32 = vadd.f32 %v515_v26, %v497_v9  ;;  %v609_v16 = vstv %s2192_s17  ;;  %v610_v18 = vstv %s2194_s18  ;;  %s2340_s17 = sld [smem:[#allocation3 + $0x45]] }
  0xce   : > { %v534_v37 = vsel %vm2170_vm2, %v532_v27, 0.0  ;;  %v535_v41 = vsel %vm303_vm12, %v533_v30, 0.0  ;;  %v541_v44 = vpop.permute.xlu1 %540  ;;  %v539_v45 = vpop.permute.xlu0 %538  ;;  %v2243_v21 = vadd.s32 4294967280, %v1799_v33  ;;  %v611_v26 = vsel %vm3405_vm4, %v609_v16, %v610_v18  ;;  %s2342_s18 = sld [smem:[#allocation3 + $0x15]] }
  0xcf   : > { %v536_v49 = vadd.f32 %v534_v37, %v516_v24  ;;  %v537_v51 = vadd.f32 %v535_v41, %v517_v32  ;;  %v543_v52 = vsel %vm542_vm1, %v539_v45, %v541_v44  ;;  %v544_v39 = vsel %vm542_vm1, %v541_v44, %v539_v45 }
  0xd0   : > { %v552_v53 = vmul.f32 %v551_v34, %v544_v39  ;;  %v553_v57 = vmul.f32 %v551_v34, %v543_v52  ;;  %1133 = vrot.lane.b32.xlu1 %v1743_v31, %s1674_s1  ;;  %1131 = vrot.lane.b32.xlu0 %v1739_v28, %s1674_s1  ;;  %vm602_vm1 = vcmp.lt.s32.totalorder %v1799_v33, 29  ;;  %vm3439_vm2 = vcmp.lt.s32.totalorder %v1925_v7, 16  ;;  %s2344_s1 = sld [smem:[#allocation3 + $0x46]] }
  0xd1   : > { %v629_v34 = vstv %s2209_s19  ;;  %v630_v37 = vstv %s2211_s20  ;;  %s2350_s19 = sld [smem:[#allocation3 + $0x16]]  ;;  %s2352_s20 = sld [smem:[#allocation3 + $0x47]] }
  0xd2   : > { %v554_v54 = vsel %vm240_vm11, %v552_v53, 0.0  ;;  %v557_v42 = vadd.f32 %v553_v57, %v537_v51  ;;  %v561_v55 = vpop.permute.xlu1 %560  ;;  %v559_v59 = vpop.permute.xlu0 %558  ;;  %v631_v51 = vsel %vm3405_vm4, %v629_v34, %v630_v37  ;;  %v670_v34 = vstv %s2320_s7  ;;  %s2419_s7 = sld [smem:[#allocation3 + $0x4e]] }
  0xd3   : > { %v556_v40 = vadd.f32 %v554_v54, %v536_v49  ;;  %v563_v0 = vsel %vm562_vm7, %v559_v59, %v561_v55  ;;  %v564_v1 = vsel %vm562_vm7, %v561_v55, %v559_v59  ;;  %vm3440_vm7 = vcmp.lt.s32.totalorder %v1953_v17, 16 }
  0xd4   : > { %v572_v2 = vmul.f32 %v571_v35, %v564_v1  ;;  %v573_v11 = vmul.f32 %v571_v35, %v563_v0  ;;  %1153 = vrot.lane.b32.xlu1 %v1743_v31, %s1675_s22  ;;  %1151 = vrot.lane.b32.xlu0 %v1739_v28, %s1675_s22  ;;  %s2354_s22 = sld [smem:[#allocation3 + $0x18]]  ;;  %v689_v37 = vstv %s2322_s8  ;;  %s2426_s8 = sld [smem:[#allocation3 + $0x1e]] }
  0xd6   : > { %v574_v13 = vsel %vm2217_vm3, %v572_v2, 0.0  ;;  %v575_v14 = vsel %vm3435_vm15, %v573_v11, 0.0  ;;  %v581_v5 = vpop.permute.xlu1 %580  ;;  %v579_v15 = vpop.permute.xlu0 %578  ;;  %vm605_vm3 = vmand %vm240_vm11, %vm3440_vm7  ;;  %vm622_vm15 = vcmp.lt.s32.totalorder %v1799_v33, 19  ;;  %vm3441_vm11 = vcmp.ge.s32.totalorder %v1899_v62, 0 }
  0xd7   : > { %v576_v19 = vadd.f32 %v574_v13, %v556_v40  ;;  %v577_v22 = vadd.f32 %v575_v14, %v557_v42  ;;  %v583_v9 = vsel %vm582_vm5, %v579_v15, %v581_v5  ;;  %v584_v20 = vsel %vm582_vm5, %v581_v5, %v579_v15 }
  0xd8   : > { %v592_v4 = vmul.f32 %v591_v12, %v584_v20  ;;  %v593_v8 = vmul.f32 %v591_v12, %v583_v9  ;;  %1173 = vrot.lane.b32.xlu1 %v1743_v31, %s1676_s23  ;;  %1171 = vrot.lane.b32.xlu0 %v1739_v28, %s1676_s23  ;;  %vm248_vm5 = vcmp.ge.s32.totalorder %v2243_v21, 0  ;;  %s2356_s23 = sld [smem:[#allocation3 + $0x49]]  ;;  %vm702_vm7 = vcmp.lt.s32.totalorder %v1799_v33, 15 }
  0xd9   : > { %vm625_vm9 = vmand %vm248_vm5, %vm3441_vm11  ;;  %vm762_vm11 = vcmp.lt.s32.totalorder %v1799_v33, 3 }
  0xda   : > { %v594_v27 = vsel %vm2236_vm6, %v592_v4, 0.0  ;;  %v595_v30 = vsel %vm3439_vm2, %v593_v8, 0.0  ;;  %v601_v24 = vpop.permute.xlu1 %600  ;;  %v599_v32 = vpop.permute.xlu0 %598  ;;  %vm642_vm6 = vcmp.lt.s32.totalorder %v1799_v33, 18  ;;  %vm682_vm2 = vcmp.lt.s32.totalorder %v1799_v33, 16 }
  0xdb   : > { %v596_v41 = vadd.f32 %v594_v27, %v576_v19  ;;  %v597_v44 = vadd.f32 %v595_v30, %v577_v22  ;;  %v603_v45 = vsel %vm602_vm1, %v599_v32, %v601_v24  ;;  %v604_v47 = vsel %vm602_vm1, %v601_v24, %v599_v32 }
  0xdc   : > { %v612_v48 = vmul.f32 %v611_v26, %v604_v47  ;;  %v613_v49 = vmul.f32 %v611_v26, %v603_v45  ;;  %1193 = vrot.lane.b32.xlu1 %v1743_v31, %s1677_s25  ;;  %1191 = vrot.lane.b32.xlu0 %v1739_v28, %s1677_s25  ;;  %s2358_s25 = sld [smem:[#allocation3 + $0x17]]  ;;  %v649_v30 = vstv %s2314_s4  ;;  %v650_v24 = vstv %s2316_s5  ;;  %s2409_s4 = sld [smem:[#allocation3 + $0x1c]] }
  0xdd   : > { %v669_v32 = vstv %s2318_s6  ;;  %v710_v45 = vstv %s2332_s11  ;;  %v2389_v47 = vsel %vm3405_vm4, %v649_v30, %v650_v24  ;;  %vm662_vm1 = vcmp.lt.s32.totalorder %v1799_v33, 17  ;;  %s2411_s5 = sld [smem:[#allocation3 + $0x4d]]  ;;  %s2440_s11 = sld [smem:[#allocation3 + $0x50]] }
  0xde   : > { %v614_v52 = vsel %vm605_vm3, %v612_v48, 0.0  ;;  %v615_v25 = vsel %vm335_vm13, %v613_v49, 0.0  ;;  %v621_v39 = vpop.permute.xlu1 %620  ;;  %v619_v53 = vpop.permute.xlu0 %618  ;;  %s2417_s6 = sld [smem:[#allocation3 + $0x1d]]  ;;  %vm722_vm3 = vcmp.lt.s32.totalorder %v1799_v33, 14 }
  0xdf   : > { %v616_v57 = vadd.f32 %v614_v52, %v596_v41  ;;  %v617_v35 = vadd.f32 %v615_v25, %v597_v44  ;;  %v623_v54 = vsel %vm622_vm15, %v619_v53, %v621_v39  ;;  %v624_v42 = vsel %vm622_vm15, %v621_v39, %v619_v53 }
  0xe0   : > { %v632_v55 = vmul.f32 %v631_v51, %v624_v42  ;;  %v633_v59 = vmul.f32 %v631_v51, %v623_v54  ;;  %1213 = vrot.lane.b32.xlu1 %v1743_v31, %s1678_s26  ;;  %1211 = vrot.lane.b32.xlu0 %v1739_v28, %s1678_s26  ;;  %s2360_s26 = sld [smem:[#allocation3 + $0x48]]  ;;  %v690_v41 = vstv %s2324_s9  ;;  %v709_v44 = vstv %s2330_s10  ;;  %s2428_s9 = sld [smem:[#allocation3 + $0x4f]] }
  0xe1   : > { %v2398_v51 = vsel %vm3405_vm4, %v669_v32, %v670_v34  ;;  %v2403_v52 = vsel %vm3405_vm4, %v689_v37, %v690_v41  ;;  %v2407_v25 = vsel %vm3405_vm4, %v709_v44, %v710_v45  ;;  %v729_v39 = vstv %s2334_s12  ;;  %s2438_s10 = sld [smem:[#allocation3 + $0x1f]]  ;;  %s2451_s12 = sld [smem:[#allocation3 + $0x20]] }
  0xe2   : > { %v634_v60 = vsel %vm625_vm9, %v632_v55, 0.0  ;;  %v635_v61 = vsel %vm3383_vm0, %v633_v59, 0.0  ;;  %v2274_v40 = vpop.permute.xlu1 %640  ;;  %v2276_v63 = vpop.permute.xlu0 %638  ;;  %v730_v53 = vstv %s2336_s13  ;;  %v749_v54 = vstv %s2338_s16  ;;  %s2453_s13 = sld [smem:[#allocation3 + $0x51]] }
  0xe3   : > { %v2278_v0 = vadd.f32 %v634_v60, %v616_v57  ;;  %v2280_v1 = vadd.f32 %v635_v61, %v617_v35  ;;  %v822_v57 = vstv %s2354_s22  ;;  %v823_v35 = vstv %s2356_s23  ;;  %s2459_s16 = sld [smem:[#allocation3 + $0x21]]  ;;  %s2699_s22 = sld [smem:[#allocation3 + $0x25]] }
  0xe4   : > { %1233 = vrot.lane.b32.xlu1 %v1743_v31, %s1679_s27  ;;  %1231 = vrot.lane.b32.xlu0 %v1739_v28, %s1679_s27  ;;  %s2364_s27 = sld [smem:[#allocation3 + $0x19]]  ;;  %v750_v42 = vstv %s2340_s17  ;;  %v769_v55 = vstv %s2342_s18  ;;  %v2445_v37 = vsel %vm3405_vm4, %v729_v39, %v730_v53  ;;  %v824_v41 = vsel %vm3405_vm4, %v822_v57, %v823_v35  ;;  %s2461_s17 = sld [smem:[#allocation3 + $0x52]] }
  0xe5   : > { %v770_v59 = vstv %s2344_s1  ;;  %v789_v60 = vstv %s2350_s19  ;;  %v790_v61 = vstv %s2352_s20  ;;  %v809_v30 = vstv %s2358_s25  ;;  %s2603_s18 = sld [smem:[#allocation3 + $0x23]]  ;;  %s2614_s1 = sld [smem:[#allocation3 + $0x54]] }
  0xe6   : > { %v2284_v2 = vpop.permute.xlu1 %660  ;;  %v2286_v11 = vpop.permute.xlu0 %658  ;;  %v810_v24 = vstv %s2360_s26  ;;  %vm742_vm15 = vcmp.lt.s32.totalorder %v1799_v33, 13  ;;  %v2466_v39 = vsel %vm3405_vm4, %v749_v54, %v750_v42  ;;  %v2470_v53 = vsel %vm3405_vm4, %v769_v55, %v770_v59  ;;  %s2673_s19 = sld [smem:[#allocation3 + $0x24]]  ;;  %s2688_s20 = sld [smem:[#allocation3 + $0x55]] }
  0xe7   : > { %v2474_v57 = vsel %vm3405_vm4, %v789_v60, %v790_v61  ;;  %v2478_v35 = vsel %vm3405_vm4, %v809_v30, %v810_v24  ;;  %v644_v54 = vsel %vm642_vm6, %v2274_v40, %v2276_v63  ;;  %v2485_v42 = vmul.f32 %v824_v41, %v1739_v28  ;;  %s2701_s23 = sld [smem:[#allocation3 + $0x56]]  ;;  %s2724_s26 = sld [smem:[#allocation3 + $0x57]] }
  0xe8   : > { %1253 = vrot.lane.b32.xlu1 %v1743_v31, %s1680_s28  ;;  %1251 = vrot.lane.b32.xlu0 %v1739_v28, %s1680_s28  ;;  %s2366_s28 = sld [smem:[#allocation3 + $0x4a]]  ;;  %v2492_v59 = vmul.f32 %v824_v41, %v1743_v31  ;;  %v902_v24 = vstv %s2409_s4  ;;  %v643_v41 = vsel %vm642_vm6, %v2276_v63, %v2274_v40  ;;  %vm782_vm9 = vcmp.lt.s32.totalorder %v1799_v33, 2  ;;  %s2713_s25 = sld [smem:[#allocation3 + $0x26]] }
  0xe9   : > { %3448 = vst [vmem:[#allocation13_spill] sm:$0xff] %v2485_v42  ;;  %v923_v40 = vstv %s2419_s7  ;;  %v942_v63 = vstv %s2426_s8  ;;  %vm3456_vm6 = vcmp.ge.s32.totalorder %v1839_v43, 0  ;;  %v963_v42 = vstv %s2440_s11  ;;  %s2787_s4 = sld [smem:[#allocation3 + $0x29]]  ;;  %s2803_s7 = sld [smem:[#allocation3 + $0x5b]] }
  0xea   : > { %v2290_v12 = vpop.permute.xlu1 %680  ;;  %v2292_v13 = vpop.permute.xlu0 %678  ;;  %v842_v44 = vstv %s2364_s27  ;;  %3450 = vst [vmem:[#allocation15_spill] sm:$0xff] %v2492_v59  ;;  %vm2534_vm0 = vmand %vm248_vm5, %vm3456_vm6  ;;  %vm802_vm6 = vcmp.lt.s32.totalorder %v1799_v33, 1  ;;  %s2726_s27 = sld [smem:[#allocation3 + $0x27]]  ;;  %s2868_s8 = sld [smem:[#allocation3 + $0x2b]] }
  0xeb   : > { %v684_v59 = vsel %vm682_vm2, %v2290_v12, %v2292_v13  ;;  %s2997_s11 = sld [smem:[#allocation3 + $0x5d]] }
  0xec   : > { %1273 = vrot.lane.b32.xlu1 %v1743_v31, %s1681_s29  ;;  %1271 = vrot.lane.b32.xlu0 %v1739_v28, %s1681_s29  ;;  %s2374_s29 = sld [smem:[#allocation3 + $0x1a]] }
  0xee   : > { %v2296_v14 = vpop.permute.xlu1 %700  ;;  %v2298_v5 = vpop.permute.xlu0 %698  ;;  %v843_v45 = vstv %s2366_s28  ;;  %s2734_s28 = sld [smem:[#allocation3 + $0x58]] }
  0xef   : > { %v2489_v55 = vsel %vm3405_vm4, %v842_v44, %v843_v45  ;;  %v922_v44 = vstv %s2417_s6  ;;  %s2794_s6 = sld [smem:[#allocation3 + $0x2a]] }
  0xf0   : > { %1293 = vrot.lane.b32.xlu1 %v1743_v31, %s1682_s30  ;;  %1291 = vrot.lane.b32.xlu0 %v1739_v28, %s1682_s30  ;;  %s2376_s30 = sld [smem:[#allocation3 + $0x4b]]  ;;  %3449 = vst [vmem:[#allocation14_spill] sm:$0xff] %v2489_v55  ;;  %v2508_v31 = vadd.s32 16, %v1808_v36  ;;  %v982_v55 = vstv %s2451_s12  ;;  %v2581_v10 = vsel %vm3405_vm4, %v922_v44, %v923_v40  ;;  %s3041_s12 = sld [smem:[#allocation3 + $0x2d]] }
  0xf2   : > { %v2302_v15 = vpop.permute.xlu1 %720  ;;  %v2304_v16 = vpop.permute.xlu0 %718  ;;  %3455 = vst [vmem:[#allocation20_spill] sm:$0xff] %v2508_v31 }
  0xf6   : > { %v2306_v18 = vpop.permute.xlu1 %740  ;;  %v2308_v19 = vpop.permute.xlu0 %738 }
  0xf7   : > { %v743_v21 = vsel %vm742_vm15, %v2308_v19, %v2306_v18 }
  0xfa   : > { %v2310_v22 = vpop.permute.xlu1 %760  ;;  %v2312_v23 = vpop.permute.xlu0 %758 }
  0xfe   : > { %v2326_v9 = vpop.permute.xlu1 %780  ;;  %v2328_v20 = vpop.permute.xlu0 %778 }
 0x102   : > { %v2346_v4 = vpop.permute.xlu1 %800  ;;  %v2348_v8 = vpop.permute.xlu0 %798 }
 0x106   : > { %v2362_v26 = vpop.permute.xlu1 %833  ;;  %v2368_v27 = vpop.permute.xlu0 %831 }
 0x107   : > { %3442 = vst [vmem:[#allocation7_spill] sm:$0xff] %v2362_v26  ;;  %3443 = vst [vmem:[#allocation8_spill] sm:$0xff] %v2368_v27  ;;  %v983_v27 = vstv %s2453_s13  ;;  %v692_v26 = vmul.f32 %v2403_v52, %v684_v59  ;;  %s3075_s13 = sld [smem:[#allocation3 + $0x5e]] }
 0x108   : > { %v2601_v44 = vsel %vm3405_vm4, %v982_v55, %v983_v27  ;;  %v744_v55 = vsel %vm742_vm15, %v2306_v18, %v2308_v19  ;;  %v1042_v19 = vstv %s2603_s18  ;;  %vm3472_vm15 = vcmp.lt.s32.totalorder %v1909_v3, 16  ;;  %s3271_s18 = sld [smem:[#allocation3 + $0x30]] }
 0x10a   : > { %v2392_v48 = vpop.permute.xlu1 %853  ;;  %v2394_v49 = vpop.permute.xlu0 %851 }
 0x10b   : > { %3444 = vst [vmem:[#allocation9_spill] sm:$0xff] %v2392_v48  ;;  %3445 = vst [vmem:[#allocation10_spill] sm:$0xff] %v2394_v49  ;;  %v882_v49 = vstv %s2382_s21  ;;  %v883_v48 = vstv %s2384_s0  ;;  %s2521_s0 = sld [smem:[#allocation3 + $0x22]]  ;;  %s2523_s21 = sld [smem:[#allocation3 + $0x53]] }
 0x10c   : > { %v2505_v30 = vsel %vm3405_vm4, %v882_v49, %v883_v48  ;;  %v652_v48 = vmul.f32 %v2389_v47, %v644_v54  ;;  %v943_v49 = vstv %s2428_s9  ;;  %v663_v54 = vsel %vm662_vm1, %v2286_v11, %v2284_v2  ;;  %s2918_s9 = sld [smem:[#allocation3 + $0x5c]] }
 0x10d   : > { %3454 = vst [vmem:[#allocation19_spill] sm:$0xff] %v2505_v30 }
 0x10e   : > { %v2434_v32 = vpop.permute.xlu1 %873  ;;  %v2436_v34 = vpop.permute.xlu0 %871 }
 0x10f   : > { %3446 = vst [vmem:[#allocation11_spill] sm:$0xff] %v2434_v32  ;;  %3447 = vst [vmem:[#allocation12_spill] sm:$0xff] %v2436_v34  ;;  %v862_v34 = vstv %s2374_s29  ;;  %v863_v32 = vstv %s2376_s30  ;;  %s2744_s29 = sld [smem:[#allocation3 + $0x28]]  ;;  %s2746_s30 = sld [smem:[#allocation3 + $0x59]] }
 0x110   : > { %v2501_v28 = vsel %vm3405_vm4, %v862_v34, %v863_v32  ;;  %v664_v32 = vsel %vm662_vm1, %v2284_v2, %v2286_v11  ;;  %v903_v34 = vstv %s2411_s5  ;;  %vm2561_vm1 = vmand %vm248_vm5, %vm302_vm8  ;;  %v704_v11 = vsel %vm702_vm7, %v2296_v14, %v2298_v5  ;;  %s2789_s5 = sld [smem:[#allocation3 + $0x5a]] }
 0x111   : > { %3453 = vst [vmem:[#allocation18_spill] sm:$0xff] %v2501_v28  ;;  %v653_v28 = vmul.f32 %v2389_v47, %v643_v41  ;;  %v672_v31 = vmul.f32 %v2398_v51, %v664_v32  ;;  %v2571_v47 = vsel %vm3405_vm4, %v902_v24, %v903_v34  ;;  %v1002_v41 = vstv %s2459_s16  ;;  %s3125_s16 = sld [smem:[#allocation3 + $0x2e]] }
 0x112   : > { %v2494_v60 = vpop.permute.xlu1 %893  ;;  %v2496_v61 = vpop.permute.xlu0 %891  ;;  %v1003_v32 = vstv %s2461_s17  ;;  %v724_v24 = vsel %vm722_vm3, %v2302_v15, %v2304_v16  ;;  %s3185_s17 = sld [smem:[#allocation3 + $0x5f]] }
 0x113   : > { %3451 = vst [vmem:[#allocation16_spill] sm:$0xff] %v2494_v60  ;;  %3452 = vst [vmem:[#allocation17_spill] sm:$0xff] %v2496_v61  ;;  %v962_v60 = vstv %s2438_s10  ;;  %v655_v40 = vsel %vm295_vm10, %v653_v28, 0.0  ;;  %v674_v45 = vsel %vm2561_vm1, %v672_v31, 0.0  ;;  %v1023_v28 = vstv %s2523_s21  ;;  %s2927_s10 = sld [smem:[#allocation3 + $0x2c]]  ;;  %s3228_s21 = sld [smem:[#allocation3 + $0x60]] }
 0x114   : > { %v2597_v59 = vsel %vm3405_vm4, %v962_v60, %v963_v42  ;;  %v1022_v60 = vstv %s2521_s0  ;;  %v657_v2 = vadd.f32 %v655_v40, %v2280_v1  ;;  %vm3465_vm1 = vcmp.lt.s32.totalorder %v1922_v6, 16  ;;  %s3226_s0 = sld [smem:[#allocation3 + $0x2f]] }
 0x116   : > { %v2546_v30 = vpop.permute.xlu1 %913  ;;  %v2548_v61 = vpop.permute.xlu0 %911 }
 0x117   : > { %3459 = vst [vmem:[#allocation21_spill] sm:$0xff] %v2546_v30  ;;  %3460 = vst [vmem:[#allocation22_spill] sm:$0xff] %v2548_v61  ;;  %v654_v61 = vsel %vm2534_vm0, %v652_v48, 0.0  ;;  %v673_v30 = vmul.f32 %v2398_v51, %v663_v54  ;;  %v2591_v48 = vsel %vm3405_vm4, %v942_v63, %v943_v49  ;;  %v712_v63 = vmul.f32 %v2407_v25, %v704_v11 }
 0x118   : > { %v2612_v49 = vsel %vm3405_vm4, %v1002_v41, %v1003_v32  ;;  %v656_v42 = vadd.f32 %v654_v61, %v2278_v0  ;;  %vm2621_vm0 = vmand %vm248_vm5, %vm3396_vm14  ;;  %v694_v0 = vsel %vm248_vm5, %v692_v26, 0.0  ;;  %v703_v61 = vsel %vm702_vm7, %v2298_v5, %v2296_v14 }
 0x119   : > { %v675_v31 = vsel %vm303_vm12, %v673_v30, 0.0  ;;  %v732_v54 = vmul.f32 %v2445_v37, %v724_v24  ;;  %v683_v41 = vsel %vm682_vm2, %v2292_v13, %v2290_v12  ;;  %vm2649_vm14 = vmand %vm248_vm5, %vm3465_vm1  ;;  %v764_v14 = vsel %vm762_vm11, %v2310_v22, %v2312_v23 }
 0x11a   : > { %v2587_v34 = vpop.permute.xlu1 %933  ;;  %v2593_v51 = vpop.permute.xlu0 %931  ;;  %v676_v11 = vadd.f32 %v674_v45, %v656_v42  ;;  %v714_v12 = vsel %vm2621_vm0, %v712_v63, 0.0  ;;  %v723_v13 = vsel %vm722_vm3, %v2304_v16, %v2302_v15  ;;  %v752_v30 = vmul.f32 %v2466_v39, %v744_v55 }
 0x11b   : > { %vm835_vm2 = vcmp.lt.s32.totalorder %v1799_v33, 127  ;;  %v2671_v32 = vsel %vm3405_vm4, %v1022_v60, %v1023_v28  ;;  %v677_v24 = vadd.f32 %v675_v31, %v657_v2  ;;  %v713_v45 = vmul.f32 %v2407_v25, %v703_v61 }
 0x11c   : > { %3468 = vst [vmem:[#allocation23_spill] sm:$0xff] %v2671_v32  ;;  %v696_v40 = vadd.f32 %v694_v0, %v676_v11  ;;  %vm3469_vm7 = vcmp.lt.s32.totalorder %v1953_v17, 16  ;;  %v784_v16 = vsel %vm782_vm9, %v2326_v9, %v2328_v20  ;;  %v693_v63 = vmul.f32 %v2403_v52, %v683_v41 }
 0x11d   : > { %vm2680_vm3 = vmand %vm248_vm5, %vm3469_vm7  ;;  %v734_v25 = vsel %vm2649_vm14, %v732_v54, 0.0  ;;  %v772_v42 = vmul.f32 %v2470_v53, %v764_v14  ;;  %vm855_vm5 = vcmp.lt.s32.totalorder %v1799_v33, 126  ;;  %v733_v52 = vmul.f32 %v2445_v37, %v723_v13 }
 0x11e   : > { %v2657_v1 = vpop.permute.xlu1 %953  ;;  %v2659_v5 = vpop.permute.xlu0 %951  ;;  %v716_v27 = vadd.f32 %v714_v12, %v696_v40  ;;  %v804_v55 = vsel %vm802_vm6, %v2346_v4, %v2348_v8  ;;  %v754_v28 = vsel %vm2680_vm3, %v752_v30, 0.0  ;;  %v763_v37 = vsel %vm762_vm11, %v2312_v23, %v2310_v22 }
 0x11f   : > { %v792_v31 = vmul.f32 %v2474_v57, %v784_v16  ;;  %vm875_vm14 = vcmp.lt.s32.totalorder %v1799_v33, 125  ;;  %v1043_v0 = vstv %s2614_s1  ;;  %v715_v61 = vsel %vm3472_vm15, %v713_v45, 0.0  ;;  %s3273_s1 = sld [smem:[#allocation3 + $0x61]] }
 0x120   : > { %v736_v54 = vadd.f32 %v734_v25, %v716_v27  ;;  %v753_v2 = vmul.f32 %v2466_v39, %v743_v21  ;;  %v2732_v11 = vadd.s32 32, %v1808_v36  ;;  %v697_v22 = vadd.f32 %v693_v63, %v677_v24 }
 0x121   : > { %vm3473_vm11 = vcmp.ge.s32.totalorder %v1899_v62, 0  ;;  %v783_v41 = vsel %vm782_vm9, %v2328_v20, %v2326_v9  ;;  %v812_v26 = vmul.f32 %v2478_v35, %v804_v55  ;;  %vm895_vm0 = vcmp.lt.s32.totalorder %v1799_v33, 115 }
 0x122   : > { %v2708_v60 = vpop.permute.xlu1 %973  ;;  %v2710_v18 = vpop.permute.xlu0 %971  ;;  %v774_v23 = vsel %vm3473_vm11, %v772_v42, 0.0  ;;  %vm3474_vm1 = vcmp.lt.s32.totalorder %v1925_v7, 16  ;;  %v756_v14 = vadd.f32 %v754_v28, %v736_v54  ;;  %v773_v12 = vmul.f32 %v2470_v53, %v763_v37  ;;  %v3477_v42 = vld [vmem:[#allocation6_spill] sm:$0xff] }
 0x123   : > { %v735_v39 = vsel %vm3474_vm1, %v733_v52, 0.0  ;;  %v2757_v20 = vsel %vm3405_vm4, %v1042_v19, %v1043_v0  ;;  %v717_v30 = vadd.f32 %v715_v61, %v697_v22  ;;  %vm3476_vm9 = vcmp.ge.s32.totalorder %v1839_v43, 0  ;;  %v3480_v19 = vld [vmem:[#allocation8_spill] sm:$0xff] }
 0x124   : > { %3475 = vst [vmem:[#allocation24_spill] sm:$0xff] %v2757_v20  ;;  %v794_v24 = vsel %vm3476_vm9, %v792_v31, 0.0  ;;  %v803_v40 = vsel %vm802_vm6, %v2348_v8, %v2346_v4  ;;  %vm915_vm7 = vcmp.lt.s32.totalorder %v1799_v33, 114  ;;  %v1062_v53 = vstv %s2673_s19  ;;  %s1319_s19 = sld [smem:[#allocation2]] }
 0x125   : > { %v755_v45 = vsel %vm335_vm13, %v753_v2, 0.0  ;;  %v776_v15 = vadd.f32 %v774_v23, %v756_v14  ;;  %v793_v16 = vmul.f32 %v2474_v57, %v783_v41  ;;  %v1063_v63 = vstv %s2688_s20  ;;  %v3479_v57 = vld [vmem:[#allocation7_spill] sm:$0xff]  ;;  %v3481_v23 = vld [vmem:[#allocation9_spill] sm:$0xff]  ;;  %v3482_v41 = vld [vmem:[#allocation10_spill] sm:$0xff]  ;;  %s3580_s20 = sshll.u32 %s3582_s15, 3 }
 0x126   : > { %v2751_v13 = vpop.permute.xlu1 %993  ;;  %v2753_v9 = vpop.permute.xlu0 %991  ;;  %v737_v25 = vadd.f32 %v735_v39, %v717_v30  ;;  %v814_v21 = vsel %vm302_vm8, %v812_v26, 0.0  ;;  %vm935_vm3 = vcmp.lt.s32.totalorder %v1799_v33, 113  ;;  %v1082_v4 = vstv %s2699_s22 }
 0x127   : > { %v1083_v8 = vstv %s2701_s23  ;;  %vm3478_vm6 = vcmp.ge.s32.totalorder %v3477_v42, 0  ;;  %v796_v52 = vadd.f32 %v794_v24, %v776_v15  ;;  %v813_v55 = vmul.f32 %v2478_v35, %v803_v40  ;;  %v3484_v15 = vld [vmem:[#allocation11_spill] sm:$0xff] }
 0x128   : > { %v775_v27 = vsel %vm3478_vm6, %v773_v12, 0.0  ;;  %v836_v28 = vsel %vm835_vm2, %v3480_v19, %v3479_v57  ;;  %v757_v0 = vadd.f32 %v755_v45, %v737_v25  ;;  %v1102_v61 = vstv %s2713_s25  ;;  %v3483_v12 = vld [vmem:[#allocation14_spill] sm:$0xff]  ;;  %v3485_v25 = vld [vmem:[#allocation12_spill] sm:$0xff]  ;;  %s185_s25 = scalar_lea.vmem %s3374_s3, %s3580_s20 }
 0x129   : > { %v1103_v54 = vstv %s2724_s26  ;;  %v1122_v2 = vstv %s2726_s27  ;;  %v795_v35 = vsel %vm295_vm10, %v793_v16, 0.0  ;;  %v816_v22 = vadd.f32 %v814_v21, %v796_v52  ;;  %v3486_v21 = vld [vmem:[#allocation20_spill] sm:$0xff] }
 0x12a   : > { %v2783_v37 = vpop.permute.xlu1 %1013  ;;  %v2785_v31 = vpop.permute.xlu0 %1011  ;;  %v856_v26 = vsel %vm855_vm5, %v3482_v41, %v3481_v23  ;;  %v1123_v39 = vstv %s2734_s28  ;;  %v777_v14 = vadd.f32 %v775_v27, %v757_v0  ;;  %v845_v30 = vmul.f32 %v3483_v12, %v836_v28  ;;  %v3490_v0 = vld [vmem:[#allocation18_spill] sm:$0xff] }
 0x12b   : > { %v1142_v24 = vstv %s2744_s29  ;;  %v1143_v40 = vstv %s2746_s30  ;;  %v815_v45 = vsel %vm303_vm12, %v813_v55, 0.0  ;;  %v876_v16 = vsel %vm875_vm14, %v3485_v25, %v3484_v15 }
 0x12c   : > { %vm265_vm15 = vcmp.lt.s32.totalorder %v3486_v21, 256  ;;  %v2819_v20 = vsel %vm3405_vm4, %v1062_v53, %v1063_v63  ;;  %v2823_v27 = vsel %vm3405_vm4, %v1082_v4, %v1083_v8  ;;  %v797_v28 = vadd.f32 %v795_v35, %v777_v14  ;;  %v3492_v63 = vld [vmem:[#allocation13_spill] sm:$0xff]  ;;  %v3493_v8 = vld [vmem:[#allocation16_spill] sm:$0xff] }
 0x12d   : > { %3488 = vst [vmem:[#allocation7_spill] sm:$0xff] %v2819_v20  ;;  %3489 = vst [vmem:[#allocation8_spill] sm:$0xff] %v2823_v27  ;;  %v837_v55 = vsel %vm835_vm2, %v3479_v57, %v3480_v19  ;;  %v865_v32 = vmul.f32 %v3490_v0, %v856_v26  ;;  %vm975_vm11 = vcmp.lt.s32.totalorder %v1799_v33, 111  ;;  %v2835_v53 = vsel %vm3405_vm4, %v1102_v61, %v1103_v54  ;;  %v3494_v35 = vld [vmem:[#allocation17_spill] sm:$0xff]  ;;  %v3502_v27 = vld [vmem:[#allocation15_spill] sm:$0xff] }
 0x12e   : > { %v2815_v52 = vpop.permute.xlu1 %1033  ;;  %3491 = vst [vmem:[#allocation9_spill] sm:$0xff] %v2835_v53  ;;  %v829_v4 = vadd.f32 %v3492_v63, %v816_v22  ;;  %v896_v14 = vsel %vm895_vm0, %v3494_v35, %v3493_v8  ;;  %vm955_vm2 = vcmp.lt.s32.totalorder %v1799_v33, 112  ;;  %v2845_v57 = vsel %vm3405_vm4, %v1122_v2, %v1123_v39  ;;  %v3498_v22 = vld [vmem:[#allocation19_spill] sm:$0xff]  ;;  %v3499_v39 = vld [vmem:[#allocation21_spill] sm:$0xff] }
 0x12f   : > { %3487 = vst [vmem:[#allocation6_spill] sm:$0xff] %v2815_v52  ;;  %v2831_v52 = vpop.permute.xlu0 %1031  ;;  %3495 = vst [vmem:[#allocation10_spill] sm:$0xff] %v2845_v57  ;;  %v2849_v19 = vsel %vm3405_vm4, %v1142_v24, %v1143_v40  ;;  %v817_v26 = vadd.f32 %v815_v45, %v797_v28  ;;  %vm3497_vm1 = vcmp.lt.s32.totalorder %v1893_v58, 16  ;;  %v857_v54 = vsel %vm855_vm5, %v3481_v23, %v3482_v41  ;;  %v3500_v24 = vld [vmem:[#allocation22_spill] sm:$0xff] }
 0x130   : > { %3496 = vst [vmem:[#allocation14_spill] sm:$0xff] %v2849_v19  ;;  %v847_v61 = vsel %vm3497_vm1, %v845_v30, 0.0  ;;  %v885_v63 = vmul.f32 %v3498_v22, %v876_v16  ;;  %vm995_vm9 = vcmp.lt.s32.totalorder %v1799_v33, 110  ;;  %v846_v2 = vmul.f32 %v3483_v12, %v837_v55 }
 0x131   : > { %v916_v40 = vsel %vm915_vm7, %v3500_v24, %v3499_v39  ;;  %v1162_v30 = vstv %s2787_s4  ;;  %v1163_v28 = vstv %s2789_s5  ;;  %vm3501_vm5 = vcmp.lt.s32.totalorder %v1922_v6, 16 }
 0x132   : > { %v2864_v45 = vpop.permute.xlu1 %1053  ;;  %v867_v23 = vsel %vm3501_vm5, %v865_v32, 0.0  ;;  %v877_v41 = vsel %vm875_vm14, %v3484_v15, %v3485_v25  ;;  %v905_v12 = vmul.f32 %v2571_v47, %v896_v14  ;;  %vm1015_vm6 = vcmp.lt.s32.totalorder %v1799_v33, 109 }
 0x133   : > { %v2878_v16 = vpop.permute.xlu0 %1051  ;;  %v1182_v55 = vstv %s2794_s6  ;;  %v849_v19 = vadd.f32 %v847_v61, %v829_v4  ;;  %v866_v57 = vmul.f32 %v3490_v0, %v857_v54  ;;  %v936_v32 = vsel %vm935_vm3, %v2593_v51, %v2587_v34 }
 0x134   : > { %v1183_v53 = vstv %s2803_s7  ;;  %v830_v20 = vadd.f32 %v3502_v27, %v817_v26  ;;  %vm3503_vm14 = vcmp.lt.s32.totalorder %v1953_v17, 16  ;;  %v897_v25 = vsel %vm895_vm0, %v3493_v8, %v3494_v35 }
 0x135   : > { %v887_v15 = vsel %vm3503_vm14, %v885_v63, 0.0  ;;  %v925_v4 = vmul.f32 %v2581_v10, %v916_v40  ;;  %vm1035_vm1 = vcmp.lt.s32.totalorder %v1799_v33, 99  ;;  %vm3504_vm5 = vcmp.lt.s32.totalorder %v1909_v3, 16 }
 0x136   : > { %v848_v0 = vsel %vm3504_vm5, %v846_v2, 0.0  ;;  %v869_v14 = vadd.f32 %v867_v23, %v849_v19  ;;  %v886_v61 = vmul.f32 %v3498_v22, %v877_v41  ;;  %v917_v27 = vsel %vm915_vm7, %v3499_v39, %v3500_v24  ;;  %v2903_v26 = vpop.permute.xlu1 %1073 }
 0x137   : > { %vm3505_vm14 = vcmp.ge.s32.totalorder %v1899_v62, 0  ;;  %v945_v35 = vmul.f32 %v2591_v48, %v936_v32  ;;  %vm1055_vm0 = vcmp.lt.s32.totalorder %v1799_v33, 98  ;;  %v2909_v54 = vpop.permute.xlu0 %1071  ;;  %v2913_v19 = vsel %vm3405_vm4, %v1162_v30, %v1163_v28 }
 0x138   : > { %v907_v8 = vsel %vm3505_vm14, %v905_v12, 0.0  ;;  %v2916_v22 = vadd.s32 48, %v1808_v36  ;;  %vm3506_vm7 = vcmp.lt.s32.totalorder %v1925_v7, 16  ;;  %v889_v2 = vadd.f32 %v887_v15, %v869_v14 }
 0x139   : > { %v868_v63 = vsel %vm3506_vm7, %v866_v57, 0.0  ;;  %v906_v39 = vmul.f32 %v2571_v47, %v897_v25  ;;  %v2925_v24 = vsel %vm3405_vm4, %v1182_v55, %v1183_v53  ;;  %v850_v40 = vadd.f32 %v848_v0, %v830_v20 }
 0x13a   : > { %vm3507_vm5 = vcmp.ge.s32.totalorder %v3477_v42, 0  ;;  %v926_v57 = vmul.f32 %v2581_v10, %v917_v27  ;;  %vm3510_vm7 = vcmp.ge.s32.totalorder %v1839_v43, 0  ;;  %v937_v53 = vsel %vm935_vm3, %v2587_v34, %v2593_v51  ;;  %v2959_v34 = vpop.permute.xlu1 %1093  ;;  %v3520_v10 = vld [vmem:[#allocation23_spill] sm:$0xff] }
 0x13b   : > { %vm2933_vm14 = vmand %vm265_vm15, %vm3507_vm5  ;;  %v927_v47 = vsel %vm3510_vm7, %v925_v4, 0.0  ;;  %vm1075_vm4 = vcmp.lt.s32.totalorder %v1799_v33, 97  ;;  %v888_v20 = vsel %vm335_vm13, %v886_v61, 0.0  ;;  %v909_v30 = vadd.f32 %v907_v8, %v889_v2  ;;  %v2972_v32 = vpop.permute.xlu0 %1091 }
 0x13c   : > { %vm2951_vm5 = vmand %vm265_vm15, %vm295_vm10  ;;  %v976_v28 = vsel %vm975_vm11, %v2710_v18, %v2708_v60  ;;  %v1202_v51 = vstv %s2868_s8  ;;  %v870_v23 = vadd.f32 %v868_v63, %v850_v40  ;;  %v947_v41 = vsel %vm302_vm8, %v945_v35, 0.0 }
 0x13d   : > { %v956_v12 = vsel %vm955_vm2, %v2659_v5, %v2657_v1  ;;  %v957_v55 = vsel %vm955_vm2, %v2657_v1, %v2659_v5  ;;  %v908_v15 = vsel %vm2933_vm14, %v906_v39, 0.0  ;;  %v929_v25 = vadd.f32 %v927_v47, %v909_v30  ;;  %vm2988_vm2 = vmand %vm265_vm15, %vm303_vm12  ;;  %v3515_v47 = vld [vmem:[#allocation6_spill] sm:$0xff] }
 0x13e   : > { %v946_v4 = vmul.f32 %v2591_v48, %v937_v53  ;;  %v996_v0 = vsel %vm995_vm9, %v2753_v9, %v2751_v13  ;;  %vm273_vm3 = vcmp.lt.s32.totalorder %v2732_v11, 256  ;;  %v890_v14 = vadd.f32 %v888_v20, %v870_v23  ;;  %v3005_v2 = vpop.permute.xlu1 %1113  ;;  %v3534_v20 = vld [vmem:[#allocation8_spill] sm:$0xff] }
 0x13f   : > { %v928_v61 = vsel %vm2951_vm5, %v926_v57, 0.0  ;;  %v977_v48 = vsel %vm975_vm11, %v2708_v60, %v2710_v18  ;;  %v985_v5 = vmul.f32 %v2601_v44, %v976_v28  ;;  %v949_v27 = vadd.f32 %v947_v41, %v929_v25 }
 0x140   : > { %v965_v8 = vmul.f32 %v2597_v59, %v956_v12  ;;  %v966_v35 = vmul.f32 %v2597_v59, %v957_v55  ;;  %v1016_v63 = vsel %vm1015_vm6, %v2785_v31, %v2783_v37  ;;  %v910_v39 = vadd.f32 %v908_v15, %v890_v14  ;;  %v3014_v59 = vpop.permute.xlu0 %1111 }
 0x141   : > { %v997_v60 = vsel %vm995_vm9, %v2751_v13, %v2753_v9  ;;  %v1005_v18 = vmul.f32 %v2612_v49, %v996_v0  ;;  %vm1095_vm11 = vcmp.lt.s32.totalorder %v1799_v33, 96  ;;  %vm1115_vm14 = vcmp.lt.s32.totalorder %v1799_v33, 95 }
 0x142   : > { %v1203_v40 = vstv %s2918_s9  ;;  %v948_v36 = vsel %vm2988_vm2, %v946_v4, 0.0  ;;  %v986_v57 = vmul.f32 %v2601_v44, %v977_v48  ;;  %v1036_v53 = vsel %vm1035_vm1, %v2831_v52, %v3515_v47  ;;  %v3050_v15 = vpop.permute.xlu1 %1133  ;;  %v3525_v4 = vld [vmem:[#allocation24_spill] sm:$0xff] }
 0x143   : > { %v1222_v13 = vstv %s2927_s10  ;;  %v930_v9 = vadd.f32 %v928_v61, %v910_v39  ;;  %vm3516_vm9 = vcmp.lt.s32.totalorder %v1909_v3, 16  ;;  %vm3519_vm5 = vcmp.lt.s32.totalorder %v1893_v58, 16 }
 0x144   : > { %vm3029_vm7 = vmand %vm265_vm15, %vm3516_vm9  ;;  %v987_v30 = vsel %vm3519_vm5, %v985_v5, 0.0  ;;  %v1017_v44 = vsel %vm1015_vm6, %v2783_v37, %v2785_v31  ;;  %v1025_v28 = vmul.f32 %v3520_v10, %v1016_v63  ;;  %v968_v23 = vsel %vm265_vm15, %v966_v35, 0.0  ;;  %v1132_v14 = vpop.permute.xlu0 %1131  ;;  %v3529_v35 = vld [vmem:[#allocation7_spill] sm:$0xff] }
 0x145   : > { %v969_v41 = vadd.f32 %v965_v8, %v949_v27  ;;  %v1006_v12 = vmul.f32 %v2612_v49, %v997_v60  ;;  %v1056_v55 = vsel %vm1055_vm0, %v2878_v16, %v2864_v45  ;;  %v950_v37 = vadd.f32 %v948_v36, %v930_v9 }
 0x146   : > { %vm3521_vm6 = vcmp.lt.s32.totalorder %v1925_v7, 16  ;;  %vm3524_vm5 = vcmp.lt.s32.totalorder %v1922_v6, 16  ;;  %v1037_v25 = vsel %vm1035_vm1, %v3515_v47, %v2831_v52  ;;  %v1045_v0 = vmul.f32 %v3525_v4, %v1036_v53  ;;  %vm3081_vm1 = vmand %vm265_vm15, %vm335_vm13  ;;  %v3546_v53 = vld [vmem:[#allocation14_spill] sm:$0xff] }
 0x147   : > { %vm3056_vm9 = vmand %vm265_vm15, %vm3521_vm6  ;;  %v1007_v49 = vsel %vm3524_vm5, %v1005_v18, 0.0  ;;  %vm1155_vm2 = vcmp.lt.s32.totalorder %v1799_v33, 93  ;;  %v988_v61 = vsel %vm3029_vm7, %v986_v57, 0.0  ;;  %v989_v1 = vadd.f32 %v987_v30, %v969_v41  ;;  %v1154_v57 = vpop.permute.xlu1 %1153 }
 0x148   : > { %v1026_v48 = vmul.f32 %v3520_v10, %v1017_v44  ;;  %v1076_v5 = vsel %vm1075_vm4, %v2909_v54, %v2903_v26  ;;  %v970_v27 = vadd.f32 %v968_v23, %v950_v37  ;;  %vm3528_vm7 = vcmp.lt.s32.totalorder %v1953_v17, 16  ;;  %v1152_v44 = vpop.permute.xlu0 %1151 }
 0x149   : > { %v1027_v8 = vsel %vm3528_vm7, %v1025_v28, 0.0  ;;  %v1065_v63 = vmul.f32 %v3529_v35, %v1056_v55  ;;  %vm1175_vm6 = vcmp.lt.s32.totalorder %v1799_v33, 83  ;;  %v1223_v39 = vstv %s2997_s11 }
 0x14a   : > { %v1008_v60 = vsel %vm3056_vm9, %v1006_v12, 0.0  ;;  %v1009_v18 = vadd.f32 %v1007_v49, %v989_v1  ;;  %v1046_v36 = vmul.f32 %v3525_v4, %v1037_v25  ;;  %v1057_v21 = vsel %vm1055_vm0, %v2864_v45, %v2878_v16 }
 0x14b   : > { %v990_v47 = vadd.f32 %v988_v61, %v970_v27  ;;  %vm3530_vm15 = vcmp.ge.s32.totalorder %v3477_v42, 0  ;;  %vm3533_vm9 = vcmp.ge.s32.totalorder %v1899_v62, 0  ;;  %v1085_v30 = vmul.f32 %v3534_v20, %v1076_v5  ;;  %v1174_v31 = vpop.permute.xlu1 %1173 }
 0x14c   : > { %vm3101_vm5 = vmand %vm273_vm3, %vm3530_vm15  ;;  %v1047_v9 = vsel %vm3533_vm9, %v1045_v0, 0.0  ;;  %vm1195_vm7 = vcmp.lt.s32.totalorder %v1799_v33, 82  ;;  %vm3535_vm0 = vcmp.lt.s32.totalorder %v1826_v38, 1  ;;  %v1028_v16 = vsel %vm3081_vm1, %v1026_v48, 0.0  ;;  %v1172_v61 = vpop.permute.xlu0 %1171 }
 0x14d   : > { %v3113_v45 = vsel %vm3535_vm0, %v1202_v51, %v1203_v40  ;;  %v1029_v10 = vadd.f32 %v1027_v8, %v1009_v18  ;;  %v1077_v28 = vsel %vm1075_vm4, %v2903_v26, %v2909_v54  ;;  %vm3536_vm15 = vmmov %vm3535_vm0  ;;  %v1010_v41 = vadd.f32 %v1008_v60, %v990_v47  ;;  %v3543_v8 = vld [vmem:[#allocation9_spill] sm:$0xff] }
 0x14e   : > { %v3123_v23 = vsel %vm3536_vm15, %v1222_v13, %v1223_v39  ;;  %v1066_v12 = vmul.f32 %v3529_v35, %v1057_v21  ;;  %vm3537_vm9 = vcmp.ge.s32.totalorder %v1839_v43, 0  ;;  %vm1215_vm1 = vcmp.lt.s32.totalorder %v1799_v33, 81  ;;  %vm3138_vm4 = vmand %vm273_vm3, %vm295_vm10 }
 0x14f   : > { %v1067_v51 = vsel %vm3537_vm9, %v1065_v63, 0.0  ;;  %v1242_v40 = vstv %s3041_s12  ;;  %v1048_v55 = vsel %vm3101_vm5, %v1046_v36, 0.0  ;;  %v1049_v26 = vadd.f32 %v1047_v9, %v1029_v10  ;;  %vm3162_vm0 = vmand %vm273_vm3, %vm303_vm12  ;;  %v3544_v63 = vld [vmem:[#allocation10_spill] sm:$0xff]  ;;  %v1194_v36 = vpop.permute.xlu1 %1193 }
 0x150   : > { %v1097_v13 = vsel %vm1095_vm11, %v2959_v34, %v2972_v32  ;;  %v1116_v37 = vsel %vm1115_vm14, %v3014_v59, %v3005_v2  ;;  %v1030_v49 = vadd.f32 %v1028_v16, %v1010_v41  ;;  %v1086_v25 = vmul.f32 %v3534_v20, %v1077_v28  ;;  %v1192_v20 = vpop.permute.xlu0 %1191 }
 0x151   : > { %v1087_v4 = vsel %vm302_vm8, %v1085_v30, 0.0  ;;  %v1096_v0 = vsel %vm1095_vm11, %v2972_v32, %v2959_v34  ;;  %vm281_vm5 = vcmp.lt.s32.totalorder %v2916_v22, 256  ;;  %v1069_v1 = vadd.f32 %v1067_v51, %v1049_v26 }
 0x152   : > { %v1117_v5 = vsel %vm1115_vm14, %v3005_v2, %v3014_v59  ;;  %vm3542_vm11 = vcmp.lt.s32.totalorder %v1799_v33, 94  ;;  %v1243_v32 = vstv %s3075_s13  ;;  %v1050_v27 = vadd.f32 %v1048_v55, %v1030_v49 }
 0x153   : > { %v1136_v34 = vsel %vm3542_vm11, %v1132_v14, %v3050_v15  ;;  %v1068_v52 = vsel %vm3138_vm4, %v1066_v12, 0.0  ;;  %v1106_v35 = vmul.f32 %v3543_v8, %v1097_v13  ;;  %v1125_v39 = vmul.f32 %v3544_v63, %v1116_v37  ;;  %vm3545_vm14 = vmmov %vm3542_vm11  ;;  %v1214_v13 = vpop.permute.xlu1 %1213 }
 0x154   : > { %vm1235_vm15 = vcmp.lt.s32.totalorder %v1799_v33, 80  ;;  %v1089_v60 = vadd.f32 %v1087_v4, %v1069_v1  ;;  %v1105_v18 = vmul.f32 %v3543_v8, %v1096_v0  ;;  %v1137_v2 = vsel %vm3545_vm14, %v3050_v15, %v1132_v14 }
 0x155   : > { %v1156_v59 = vsel %vm1155_vm2, %v1152_v44, %v1154_v57  ;;  %v1088_v21 = vsel %vm3162_vm0, %v1086_v25, 0.0  ;;  %v1126_v47 = vmul.f32 %v3544_v63, %v1117_v5  ;;  %v1145_v9 = vmul.f32 %v3546_v53, %v1136_v34 }
 0x156   : > { %vm3547_vm9 = vcmp.lt.s32.totalorder %v1826_v38, 1  ;;  %v1070_v16 = vadd.f32 %v1068_v52, %v1050_v27  ;;  %vm3548_vm4 = vcmp.lt.s32.totalorder %v1909_v3, 16  ;;  %v1157_v14 = vsel %vm1155_vm2, %v1154_v57, %v1152_v44 }
 0x157   : > { %v3193_v30 = vsel %vm3547_vm9, %v1242_v40, %v1243_v32  ;;  %vm3199_vm11 = vmand %vm273_vm3, %vm3548_vm4  ;;  %v1176_v10 = vsel %vm1175_vm6, %v1172_v61, %v1174_v31  ;;  %v1262_v28 = vstv %s3125_s16  ;;  %v1108_v41 = vsel %vm273_vm3, %v1106_v35, 0.0  ;;  %v1234_v63 = vpop.permute.xlu1 %1233 }
 0x158   : > { %vm3551_vm0 = vcmp.lt.s32.totalorder %v1893_v58, 16  ;;  %v1146_v51 = vmul.f32 %v3546_v53, %v1137_v2  ;;  %v1165_v40 = vmul.f32 %v2913_v19, %v1156_v59  ;;  %v1090_v55 = vadd.f32 %v1088_v21, %v1070_v16 }
 0x159   : > { %v1127_v12 = vsel %vm3551_vm0, %v1125_v39, 0.0  ;;  %v1109_v26 = vadd.f32 %v1105_v18, %v1089_v60  ;;  %vm3552_vm14 = vcmp.lt.s32.totalorder %v1925_v7, 16  ;;  %v1177_v44 = vsel %vm1175_vm6, %v1174_v31, %v1172_v61  ;;  %v1212_v31 = vpop.permute.xlu0 %1211  ;;  %vm3240_vm6 = vmand %vm273_vm3, %vm335_vm13 }
 0x15a   : > { %vm3218_vm2 = vmand %vm273_vm3, %vm3552_vm14  ;;  %v1196_v54 = vsel %vm1195_vm7, %v1192_v20, %v1194_v36  ;;  %v1128_v37 = vsel %vm3199_vm11, %v1126_v47, 0.0  ;;  %vm3555_vm9 = vcmp.lt.s32.totalorder %v1922_v6, 16  ;;  %v1166_v25 = vmul.f32 %v2913_v19, %v1157_v14 }
 0x15b   : > { %v1147_v49 = vsel %vm3555_vm9, %v1145_v9, 0.0  ;;  %v1185_v4 = vmul.f32 %v2925_v24, %v1176_v10  ;;  %v1110_v0 = vadd.f32 %v1108_v41, %v1090_v55  ;;  %v1129_v61 = vadd.f32 %v1127_v12, %v1109_v26  ;;  %v1254_v15 = vpop.permute.xlu1 %1253 }
 0x15c   : > { %v1197_v48 = vsel %vm1195_vm7, %v1194_v36, %v1192_v20  ;;  %v1216_v19 = vsel %vm1215_vm1, %v1212_v31, %v1214_v13  ;;  %v1148_v5 = vsel %vm3218_vm2, %v1146_v51, 0.0  ;;  %vm3558_vm4 = vcmp.lt.s32.totalorder %v1953_v17, 16 }
 0x15d   : > { %v1167_v34 = vsel %vm3558_vm4, %v1165_v40, 0.0  ;;  %v1186_v32 = vmul.f32 %v2925_v24, %v1177_v44  ;;  %v1205_v11 = vmul.f32 %v3113_v45, %v1196_v54  ;;  %v1130_v27 = vadd.f32 %v1128_v37, %v1110_v0  ;;  %v1232_v2 = vpop.permute.xlu0 %1231 }
 0x15e   : > { %v1149_v52 = vadd.f32 %v1147_v49, %v1129_v61  ;;  %vm3559_vm3 = vcmp.ge.s32.totalorder %v3477_v42, 0  ;;  %v1217_v35 = vsel %vm1215_vm1, %v1214_v13, %v1212_v31  ;;  %v1263_v39 = vstv %s3185_s17  ;;  %vm3279_vm1 = vmand %vm281_vm5, %vm295_vm10 }
 0x15f   : > { %vm3258_vm7 = vmand %vm281_vm5, %vm3559_vm3  ;;  %v1168_v24 = vsel %vm3240_vm6, %v1166_v25, 0.0  ;;  %vm3562_vm11 = vcmp.ge.s32.totalorder %v1899_v62, 0  ;;  %v1206_v18 = vmul.f32 %v3113_v45, %v1197_v48  ;;  %v1225_v42 = vmul.f32 %v3123_v23, %v1216_v19  ;;  %v1274_v49 = vpop.permute.xlu1 %1273 }
 0x160   : > { %v1187_v60 = vsel %vm3562_vm11, %v1185_v4, 0.0  ;;  %v1150_v59 = vadd.f32 %v1148_v5, %v1130_v27  ;;  %v1169_v36 = vadd.f32 %v1167_v34, %v1149_v52  ;;  %v1237_v45 = vsel %vm1235_vm15, %v1234_v63, %v1232_v2  ;;  %vm3297_vm10 = vmand %vm281_vm5, %vm303_vm12 }
 0x161   : > { %vm1255_vm0 = vcmp.lt.s32.totalorder %v1799_v33, 79  ;;  %v1188_v21 = vsel %vm3258_vm7, %v1186_v32, 0.0  ;;  %vm3565_vm14 = vcmp.ge.s32.totalorder %v1839_v43, 0  ;;  %v1226_v53 = vmul.f32 %v3123_v23, %v1217_v35  ;;  %v1252_v41 = vpop.permute.xlu0 %1251 }
 0x162   : > { %v1207_v47 = vsel %vm3565_vm14, %v1205_v11, 0.0  ;;  %vm3566_vm2 = vcmp.lt.s32.totalorder %v1826_v38, 1  ;;  %v1170_v9 = vadd.f32 %v1168_v24, %v1150_v59  ;;  %v1189_v20 = vadd.f32 %v1187_v60, %v1169_v36 }
 0x163   : > { %v1264_v46 = vsel %vm3566_vm2, %v1262_v28, %v1263_v39  ;;  %v1282_v14 = vstv %s3226_s0  ;;  %v1283_v10 = vstv %s3228_s21  ;;  %v1208_v43 = vsel %vm3279_vm1, %v1206_v18, 0.0  ;;  %vm3572_vm9 = vmmov %vm3566_vm2  ;;  %v1294_v27 = vpop.permute.xlu1 %1293 }
 0x164   : > { %v1227_v23 = vsel %vm302_vm8, %v1225_v42, 0.0  ;;  %v1236_v28 = vsel %vm1235_vm15, %v1232_v2, %v1234_v63  ;;  %v1246_v56 = vmul.f32 %v3193_v30, %v1237_v45  ;;  %v1190_v12 = vadd.f32 %v1188_v21, %v1170_v9  ;;  %vm3577_vm11 = vmmov %vm3566_vm2 }
 0x165   : > { %v1209_v51 = vadd.f32 %v1207_v47, %v1189_v20  ;;  %v1256_v40 = vsel %vm1255_vm0, %v1252_v41, %v1254_v15  ;;  %v1257_v55 = vsel %vm1255_vm0, %v1254_v15, %v1252_v41  ;;  %v1228_v50 = vsel %vm3297_vm10, %v1226_v53, 0.0  ;;  %v1272_v31 = vpop.permute.xlu0 %1271  ;;  %vm1299_vm0 = vmand %vm281_vm5, %vm335_vm13 }
 0x166   : > { %v1265_v26 = vmul.f32 %v1264_v46, %v1256_v40  ;;  %v1266_v57 = vmul.f32 %v1264_v46, %v1257_v55  ;;  %vm1275_vm8 = vcmp.lt.s32.totalorder %v1799_v33, 78  ;;  %v1210_v44 = vadd.f32 %v1208_v43, %v1190_v12  ;;  %v1606_v12 = vld [vmem:[%s1736_s24] sm:$0xff] }
 0x167   : > { %v1229_v54 = vadd.f32 %v1227_v23, %v1209_v51  ;;  %v1245_v13 = vmul.f32 %v3193_v30, %v1236_v28  ;;  %vm3569_vm12 = vcmp.lt.s32.totalorder %v1909_v3, 16  ;;  %v1284_v25 = vsel %vm3572_vm9, %v1282_v14, %v1283_v10 }
 0x168   : > { %vm3322_vm15 = vmand %vm281_vm5, %vm3569_vm12  ;;  %v1248_v4 = vsel %vm281_vm5, %v1246_v56, 0.0  ;;  %v1302_v0 = vstv %s3271_s18  ;;  %v1303_v61 = vstv %s3273_s1  ;;  %v1230_v1 = vadd.f32 %v1228_v50, %v1210_v44 }
 0x169   : > { %vm3573_vm6 = vcmp.lt.s32.totalorder %v1925_v7, 16  ;;  %v1276_v30 = vsel %vm1275_vm8, %v1272_v31, %v1274_v49  ;;  %v1277_v48 = vsel %vm1275_vm8, %v1274_v49, %v1272_v31  ;;  %vm1295_vm3 = vcmp.lt.s32.totalorder %v1799_v33, 77 }
 0x16a   : > { %vm3336_vm4 = vmand %vm281_vm5, %vm3573_vm6  ;;  %vm3576_vm7 = vcmp.lt.s32.totalorder %v1893_v58, 16  ;;  %v1268_v5 = vsel %vm3322_vm15, %v1266_v57, 0.0  ;;  %v1285_v34 = vmul.f32 %v1284_v25, %v1276_v30  ;;  %v1286_v32 = vmul.f32 %v1284_v25, %v1277_v48  ;;  %v1292_v58 = vpop.permute.xlu0 %1291 }
 0x16b   : > { %v1267_v19 = vsel %vm3576_vm7, %v1265_v26, 0.0  ;;  %v1249_v11 = vadd.f32 %v1245_v13, %v1229_v54  ;;  %v1250_v7 = vadd.f32 %v1248_v4, %v1230_v1  ;;  %v1304_v52 = vsel %vm3577_vm11, %v1302_v0, %v1303_v61 }
 0x16c   : > { %vm3578_vm1 = vcmp.lt.s32.totalorder %v1922_v6, 16  ;;  %v1288_v35 = vsel %vm3336_vm4, %v1286_v32, 0.0  ;;  %v1296_v24 = vsel %vm1295_vm3, %v1292_v58, %v1294_v27  ;;  %v1297_v60 = vsel %vm1295_vm3, %v1294_v27, %v1292_v58 }
 0x16d   : > { %v1287_v8 = vsel %vm3578_vm1, %v1285_v34, 0.0  ;;  %v1269_v63 = vadd.f32 %v1267_v19, %v1249_v11  ;;  %v1270_v39 = vadd.f32 %v1268_v5, %v1250_v7  ;;  %v1305_v6 = vmul.f32 %v1304_v52, %v1296_v24 }
 0x16e   : > { %v1306_v18 = vmul.f32 %v1304_v52, %v1297_v60  ;;  %vm3579_vm14 = vcmp.lt.s32.totalorder %v1953_v17, 16  ;;  %v1320_v22 = vstv %s1319_s19  ;;  %v1337_v10 = vsub.s32 0, %v1826_v38 }
 0x16f   : > { %v1289_v42 = vadd.f32 %v1287_v8, %v1269_v63  ;;  %v1290_v2 = vadd.f32 %v1288_v35, %v1270_v39  ;;  %v1307_v59 = vsel %vm3579_vm14, %v1305_v6, 0.0 }
 0x170   : > { %v1308_v36 = vsel %vm1299_vm0, %v1306_v18, 0.0 }
 0x171   : > { %v1309_v62 = vadd.f32 %v1307_v59, %v1289_v42  ;;  %v1310_v45 = vadd.f32 %v1308_v36, %v1290_v2 }
 0x173   : > { %v1313_v29 = vrot.slane %v1309_v62, 1  ;;  %v1314_v21 = vrot.slane %v1310_v45, 1 }
 0x175   : > { %v1317_v47 = vadd.f32 %v1313_v29, %v1309_v62  ;;  %v1318_v53 = vadd.f32 %v1314_v21, %v1310_v45 }
 0x177   : > { %v1321_v46 = vadd.f32 %v1320_v22, %v1317_v47  ;;  %v1322_v9 = vadd.f32 %v1320_v22, %v1318_v53 }
 0x179   : > { %v1524_v20 = vmul.f32 -1.442695, %v1321_v46  ;;  %v1525_v33 = vmul.f32 -1.442695, %v1322_v9 }
 0x17b   : > { %1598 = vpow2.f32 %v1524_v20 }
 0x17c   : > { %1600 = vpow2.f32 %v1525_v33 }
 0x185   : > { %v1599_v16 = vpop.eup %1598 }
 0x186   : > { %v1601_v15 = vpop.eup %1600  ;;  %v1329_v17 = vadd.f32 1.0, %v1599_v16 }
 0x187   : > { %v1330_v14 = vadd.f32 1.0, %v1601_v15 }
 0x188   : > { %1602 = vrcp.f32 %v1329_v17 }
 0x189   : > { %1604 = vrcp.f32 %v1330_v14 }
 0x192   : > { %v1603_v43 = vpop.eup %1602 }
 0x193   : > { %v1605_v23 = vpop.eup %1604  ;;  %v1338_v28 = vrot.slane %v1603_v43, %v1337_v10 }
 0x194   : > { %v1342_v56 = vrot.slane %v1605_v23, %v1337_v10 }
 0x196   : > { %v1345_v41 = vcombine.low %v1338_v28, %v1342_v56 }
 0x198   : > { %v1347_v51 = vmul.f32 %v1606_v12, %v1345_v41 }
 0x19a   : > { %1348 = vst [vmem:[%s185_s25] sm:$0xff] %v1347_v51 }
 0x19b PF: > { %s15_s14 = sadd.s32 1, %s1632_s14  }
 0x19c   : > { %p12_p1 = scmp.ge.s32.totalorder %s15_s14, 4  }
 0x19e   :  { %14 = sbr.rel (!%p12_p1) target bundleno = 4 (0x4), region = 67 }
 0x1a5   :  { %1370 = vsyncpa [#allocation4], 1 }
 0x1a6   :  { %1372 = vsyncpa [#allocation4 + $0x1], 1 }

</bundles_post_ra>
